<compile_context>
chip_gen: v7x
topology: tpu7x:2x2x1
jax: 0.10.0
libtpu: 0.0.40
codegen_flags: <defaults>
</compile_context>

<pallas_src>
import functools
import math

import jax
import jax.numpy as jnp
from jax.experimental import pallas as pl
from jax.experimental.pallas import tpu as pltpu

# ---------------- small Qwen2-like config (synthetic, deterministic init) ----------------
VOCAB = 256
HIDDEN = 64
INTERMEDIATE = 128
N_LAYERS = 2
N_HEADS = 4
N_KV_HEADS = 2
HEAD_DIM = HIDDEN // N_HEADS
RMS_EPS = 1e-6
ROPE_THETA = 1_000_000.0

_PARALLEL = pltpu.CompilerParams(dimension_semantics=("parallel",))


def _pick_tm(T):
    """Token-tile size. Prefer large tiles (mem-bound kernels reach roofline at >=512);
    on v7x (64 MiB VMEM) cap lower than on v5e/v6e (128 MiB)."""
    for tm in (512, 256, 128, 64, 32, 16, 8):
        if T % tm == 0:
            return tm
    # TODO(synk): pad the token count to a multiple of 8 for ragged T instead of one huge block.
    return T


# ---------------- Pallas kernels ----------------
def _ln_qkv_kernel(x_ref, g_ref, w_ref, b_ref, o_ref, *, eps):
    """RMSNorm -> fused (q|k|v) projection with bias. bf16 MXU inputs, f32 accumulation, bf16 out."""
    x = x_ref[...].astype(jnp.float32)
    var = jnp.mean(x * x, axis=-1, keepdims=True)
    xn = x * jax.lax.rsqrt(var + eps) * g_ref[...].astype(jnp.float32)
    acc = jnp.dot(xn.astype(w_ref.dtype), w_ref[...], preferred_element_type=jnp.float32)
    o_ref[...] = (acc + b_ref[...].astype(jnp.float32)).astype(o_ref.dtype)


def _attn_oproj_kernel(qkv_ref, cos_ref, sin_ref, ow_ref, res_ref, o_ref, *,
                       n_heads, n_kv, head_dim):
    """Causal GQA attention for one batch element, all heads, reading the lane-dense qkv slab
    directly (no HBM transposes). RoPE applied in-kernel; 1/sqrt(D) is folded into the q weights.
    Epilogue: attn @ o_w + residual (o_proj fused, no separate kernel / HBM round trip).

    TODO(synk): for real sequence lengths, tile flash-style (grid over q/kv blocks with online
    softmax scratch and causal block skipping) instead of materializing (rep*S, S) scores.
    """
    D = head_dim
    half = D // 2
    rep = n_heads // n_kv
    QD = n_heads * D
    KVD = n_kv * D

    qkv = qkv_ref[0].astype(jnp.float32)          # (S, QD + 2*KVD)
    cos = cos_ref[...]                            # (S, D) full-width HF tables
    sin = sin_ref[...]
    S = cos.shape[0]

    # causal mask, built once; tiled along rows for the rep stacked q heads
    kpos = jax.lax.broadcasted_iota(jnp.int32, (S, S), 1)
    qpos = jax.lax.broadcasted_iota(jnp.int32, (S, S), 0)
    mask = kpos <= qpos
    mask_rep = jnp.concatenate([mask] * rep, axis=0)         # (rep*S, S)
    cos_rep = jnp.concatenate([cos] * rep, axis=0)           # (rep*S, D)
    sin_rep = jnp.concatenate([sin] * rep, axis=0)

    out_cols = []
    for g in range(n_kv):                                    # static loop over KV groups
        k_g = qkv[:, QD + g * D: QD + (g + 1) * D]           # (S, D)
        v_g = qkv[:, QD + KVD + g * D: QD + KVD + (g + 1) * D]
        k_rot = jnp.concatenate([-k_g[:, half:], k_g[:, :half]], axis=-1)
        k_g = k_g * cos + k_rot * sin

        # stack this group's `rep` query heads along rows -> M = rep*S per MXU push, no KV copies
        q_g = jnp.concatenate(
            [qkv[:, (g * rep + r) * D: (g * rep + r + 1) * D] for r in range(rep)], axis=0)
        q_rot = jnp.concatenate([-q_g[:, half:], q_g[:, :half]], axis=-1)
        q_g = q_g * cos_rep + q_rot * sin_rep                # scale already folded into q weights

        s = jax.lax.dot_general(q_g, k_g, (((1,), (1,)), ((), ())),
                                preferred_element_type=jnp.float32)       # (rep*S, S)
        s = jnp.where(mask_rep, s, -1e30)
        m = jnp.max(s, axis=-1, keepdims=True)
        p = jnp.exp(s - m)
        p = p / jnp.sum(p, axis=-1, keepdims=True)           # exact divide (validation-friendly)
        o_g = jnp.dot(p, v_g, preferred_element_type=jnp.float32)         # (rep*S, D)
        out_cols.extend(o_g[r * S:(r + 1) * S, :] for r in range(rep))

    attn = jnp.concatenate(out_cols, axis=-1)                # (S, QD) lane-dense
    proj = jnp.dot(attn.astype(ow_ref.dtype), ow_ref[...], preferred_element_type=jnp.float32)
    o_ref[0] = (res_ref[0].astype(jnp.float32) + proj).astype(o_ref.dtype)


def _mlp_kernel(h_ref, g_ref, wgu_ref, wd_ref, o_ref, *, eps, inter):
    """RMSNorm -> (gate|up) fused matmul -> SwiGLU -> down matmul -> residual add."""
    # TODO(synk): at real Qwen2 sizes, tile the N/K weight axes (parallel N, arbitrary K + acc
    # scratch) instead of whole-weight-resident blocks (VMEM: 64 MiB v7x / 128 MiB v5e-v6e).
    x = h_ref[...].astype(jnp.float32)
    var = jnp.mean(x * x, axis=-1, keepdims=True)
    xn = x * jax.lax.rsqrt(var + eps) * g_ref[...].astype(jnp.float32)
    gu = jnp.dot(xn.astype(wgu_ref.dtype), wgu_ref[...], preferred_element_type=jnp.float32)
    gate = gu[:, :inter]
    up = gu[:, inter:]
    act = gate * jax.nn.sigmoid(gate) * up
    down = jnp.dot(act.astype(wd_ref.dtype), wd_ref[...], preferred_element_type=jnp.float32)
    o_ref[...] = (x + down).astype(o_ref.dtype)


def _head_ce_kernel(x_ref, g_ref, w_ref, lab_ref, out_ref, m_sc, l_sc, t_sc, *, eps, tv):
    """Final RMSNorm -> lm_head tile -> online logsumexp + target-logit accumulation.
    Grid = (token tiles [parallel], vocab tiles [arbitrary]); logits never hit HBM."""
    j = pl.program_id(1)

    @pl.when(j == 0)
    def _():
        m_sc[...] = jnp.full(m_sc.shape, -jnp.inf, dtype=jnp.float32)
        l_sc[...] = jnp.zeros(l_sc.shape, dtype=jnp.float32)
        t_sc[...] = jnp.zeros(t_sc.shape, dtype=jnp.float32)

    x = x_ref[...].astype(jnp.float32)
    var = jnp.mean(x * x, axis=-1, keepdims=True)
    xn = x * jax.lax.rsqrt(var + eps) * g_ref[...].astype(jnp.float32)
    logits = jnp.dot(xn.astype(w_ref.dtype), w_ref[...], preferred_element_type=jnp.float32)  # (TM, TV)

    labels = lab_ref[...]                                                   # (TM, 1) int32
    col = jax.lax.broadcasted_iota(jnp.int32, logits.shape, 1) + j * tv
    t_sc[...] += jnp.sum(jnp.where(col == labels, logits, 0.0), axis=-1, keepdims=True)

    m_new = jnp.maximum(m_sc[...], jnp.max(logits, axis=-1, keepdims=True))
    l_sc[...] = l_sc[...] * jnp.exp(m_sc[...] - m_new) + \
        jnp.sum(jnp.exp(logits - m_new), axis=-1, keepdims=True)
    m_sc[...] = m_new

    @pl.when(j == pl.num_programs(1) - 1)
    def _():
        valid = (labels != -100).astype(jnp.float32)        # HF ignore_index semantics
        lse = m_sc[...] + jnp.log(l_sc[...])
        out_ref[...] = (lse - t_sc[...]) * valid            # per-token NLL, masked


# ---------------- pallas_call wrappers ----------------
def ln_qkv(x, gamma, w_bf16, b):
    T, H = x.shape
    N = w_bf16.shape[1]
    TM = _pick_tm(T)
    return pl.pallas_call(
        functools.partial(_ln_qkv_kernel, eps=RMS_EPS),
        out_shape=jax.ShapeDtypeStruct((T, N), jnp.bfloat16),   # bf16 kernel-to-kernel boundary
        grid=(T // TM,),
        in_specs=[
            pl.BlockSpec((TM, H), lambda i: (i, 0)),
            pl.BlockSpec((1, H), lambda i: (0, 0)),
            pl.BlockSpec((H, N), lambda i: (0, 0)),
            pl.BlockSpec((1, N), lambda i: (0, 0)),
        ],
        out_specs=pl.BlockSpec((TM, N), lambda i: (i, 0)),
        compiler_params=_PARALLEL,
    )(x, gamma.reshape(1, H), w_bf16, b.reshape(1, N))


def attention_block(qkv, h, cos, sin, ow_bf16, B, S):
    """qkv: (T, QD+2*KVD) bf16 lane-dense slab; h: (T, H) f32 residual stream.
    Returns new residual stream (T, H) f32. Only free (contiguous) reshapes at the boundary."""
    T, QKV = qkv.shape
    H = h.shape[1]
    D = cos.shape[1]
    QD = ow_bf16.shape[0]
    n_heads = QD // D
    n_kv = (QKV - QD) // (2 * D)
    kern = functools.partial(_attn_oproj_kernel, n_heads=n_heads, n_kv=n_kv, head_dim=D)
    out = pl.pallas_call(
        kern,
        out_shape=jax.ShapeDtypeStruct((B, S, H), jnp.float32),
        grid=(B,),
        in_specs=[
            pl.BlockSpec((1, S, QKV), lambda b: (b, 0, 0)),
            pl.BlockSpec((S, D), lambda b: (0, 0)),
            pl.BlockSpec((S, D), lambda b: (0, 0)),
            pl.BlockSpec((QD, H), lambda b: (0, 0)),
            pl.BlockSpec((1, S, H), lambda b: (b, 0, 0)),
        ],
        out_specs=pl.BlockSpec((1, S, H), lambda b: (b, 0, 0)),
        compiler_params=_PARALLEL,
    )(qkv.reshape(B, S, QKV), cos, sin, ow_bf16, h.reshape(B, S, H))
    return out.reshape(T, H)


def mlp_block(h, gamma, w_gate_up_bf16, w_down_bf16):
    T, H = h.shape
    I2 = w_gate_up_bf16.shape[1]
    TM = _pick_tm(T)
    kern = functools.partial(_mlp_kernel, eps=RMS_EPS, inter=I2 // 2)
    return pl.pallas_call(
        kern,
        out_shape=jax.ShapeDtypeStruct((T, H), jnp.float32),
        grid=(T // TM,),
        in_specs=[
            pl.BlockSpec((TM, H), lambda i: (i, 0)),
            pl.BlockSpec((1, H), lambda i: (0, 0)),
            pl.BlockSpec((H, I2), lambda i: (0, 0)),
            pl.BlockSpec((I2 // 2, H), lambda i: (0, 0)),
        ],
        out_specs=pl.BlockSpec((TM, H), lambda i: (i, 0)),
        compiler_params=_PARALLEL,
    )(h, gamma.reshape(1, H), w_gate_up_bf16, w_down_bf16)


def lm_head_per_token_loss(h, gamma, w_lm_bf16, labels_shifted):
    """Returns masked per-token NLL (T, 1); reduction (sum / valid count) happens outside."""
    T, H = h.shape
    V = w_lm_bf16.shape[1]
    TM = _pick_tm(T)
    TV = 128 if V % 128 == 0 else V
    kern = functools.partial(_head_ce_kernel, eps=RMS_EPS, tv=TV)
    return pl.pallas_call(
        kern,
        out_shape=jax.ShapeDtypeStruct((T, 1), jnp.float32),
        grid=(T // TM, V // TV),
        in_specs=[
            pl.BlockSpec((TM, H), lambda i, j: (i, 0)),
            pl.BlockSpec((1, H), lambda i, j: (0, 0)),
            pl.BlockSpec((H, TV), lambda i, j: (0, j)),
            pl.BlockSpec((TM, 1), lambda i, j: (i, 0)),
        ],
        out_specs=pl.BlockSpec((TM, 1), lambda i, j: (i, 0)),
        scratch_shapes=[pltpu.VMEM((TM, 1), jnp.float32),
                        pltpu.VMEM((TM, 1), jnp.float32),
                        pltpu.VMEM((TM, 1), jnp.float32)],
        compiler_params=pltpu.CompilerParams(
            dimension_semantics=("parallel", "arbitrary")),
    )(h, gamma.reshape(1, H), w_lm_bf16, labels_shifted)


# ---------------- model ----------------
def init_params(key):
    """Synthetic Qwen2-like params. Matmul weights pre-cast to bf16 once (no per-step cast),
    1/sqrt(head_dim) folded into the q slice of the fused qkv weight/bias."""
    std = 0.02
    keys = jax.random.split(key, 2 + N_LAYERS)

    def normal(k, shape):
        return std * jax.random.normal(k, shape, dtype=jnp.float32)

    scale = 1.0 / math.sqrt(HEAD_DIM)
    QD = N_HEADS * HEAD_DIM
    KVD = N_KV_HEADS * HEAD_DIM
    params = {
        "embed": normal(keys[0], (VOCAB, HIDDEN)),
        "lm_head_w": normal(keys[1], (HIDDEN, VOCAB)).astype(jnp.bfloat16),
        "final_ln": jnp.ones((HIDDEN,), jnp.float32),
        "layers": [],
    }
    for l in range(N_LAYERS):
        lk = jax.random.split(keys[2 + l], 10)
        q_w = normal(lk[0], (HIDDEN, QD)) * scale        # attention scale folded in
        q_b = normal(lk[1], (QD,)) * scale
        k_w, k_b = normal(lk[2], (HIDDEN, KVD)), normal(lk[3], (KVD,))
        v_w, v_b = normal(lk[4], (HIDDEN, KVD)), normal(lk[5], (KVD,))
        params["layers"].append({
            "input_ln": jnp.ones((HIDDEN,), jnp.float32),
            "post_ln": jnp.ones((HIDDEN,), jnp.float32),
            # fused q|k|v and gate|up weights -> lane-dense N=128 / N=256 matmuls, pre-cast bf16
            "qkv_w": jnp.concatenate([q_w, k_w, v_w], axis=1).astype(jnp.bfloat16),
            "qkv_b": jnp.concatenate([q_b, k_b, v_b], axis=0),
            "o_w": normal(lk[6], (QD, HIDDEN)).astype(jnp.bfloat16),
            "gate_up_w": jnp.concatenate([normal(lk[7], (HIDDEN, INTERMEDIATE)),
                                          normal(lk[8], (HIDDEN, INTERMEDIATE))],
                                         axis=1).astype(jnp.bfloat16),
            "down_w": normal(lk[9], (INTERMEDIATE, HIDDEN)).astype(jnp.bfloat16),
        })
    return params


def forward(params, input_ids, labels):
    B, S = input_ids.shape
    T = B * S

    # TODO(synk): token-embedding gather stays in plain JAX (no clean block-rectangular Pallas tile).
    h = params["embed"][input_ids].reshape(T, HIDDEN).astype(jnp.float32)

    # full-width RoPE tables, HF convention: emb = concat([freqs, freqs], -1)
    inv_freq = 1.0 / (ROPE_THETA ** (jnp.arange(0, HEAD_DIM, 2, dtype=jnp.float32) / HEAD_DIM))
    freqs = jnp.outer(jnp.arange(S, dtype=jnp.float32), inv_freq)     # (S, D/2)
    emb = jnp.concatenate([freqs, freqs], axis=-1)                     # (S, D)
    cos = jnp.cos(emb)
    sin = jnp.sin(emb)

    for lyr in params["layers"]:
        # rmsnorm + fused QKV (bf16 out, lane-dense slab)
        qkv = ln_qkv(h, lyr["input_ln"], lyr["qkv_w"], lyr["qkv_b"])
        # causal GQA attention + RoPE + o_proj + residual, all in one kernel, no HBM transposes
        h = attention_block(qkv, h, cos, sin, lyr["o_w"], B, S)
        # rmsnorm + gate/up + SwiGLU + down + residual
        h = mlp_block(h, lyr["post_ln"], lyr["gate_up_w"], lyr["down_w"])

    # causal-LM loss: row (b, s) predicts labels[b, s+1]; last position per sequence ignored (-100)
    shifted = jnp.concatenate(
        [labels[:, 1:], jnp.full((B, 1), -100, dtype=labels.dtype)], axis=1
    ).reshape(T, 1).astype(jnp.int32)
    per_tok = lm_head_per_token_loss(h, params["final_ln"], params["lm_head_w"], shifted)
    valid = (shifted != -100).astype(jnp.float32)
    loss = jnp.sum(per_tok) / jnp.maximum(jnp.sum(valid), 1.0)
    return (loss,)


if __name__ == "__main__":
    key = jax.random.PRNGKey(0)
    kp, ki = jax.random.split(key)
    params = init_params(kp)

    B, S = 2, 8
    input_ids = jax.random.randint(ki, (B, S), 0, VOCAB, dtype=jnp.int32)
    labels = input_ids  # standard causal-LM setup: labels == input_ids (shift done inside)

    (loss,) = jax.jit(forward)(params, input_ids, labels)
    loss = jax.block_until_ready(loss)
    assert loss is not None and bool(jnp.isfinite(loss)), "Loss is none / non-finite?"
    print("KERNEL_OK")
</pallas_src>

<mosaic_0001>
module attributes {stable_mosaic.version = 11 : i64} {
  func.func @_ln_qkv_kernel(%arg0: i32, %arg1: memref<16x64xf32, #tpu.memory_space<vmem>>, %arg2: memref<1x64xf32, #tpu.memory_space<vmem>>, %arg3: memref<64x128xbf16, #tpu.memory_space<vmem>>, %arg4: memref<1x128xf32, #tpu.memory_space<vmem>>, %arg5: memref<16x128xbf16, #tpu.memory_space<vmem>>) attributes {dimension_semantics = [#tpu.dimension_semantics<parallel>], iteration_bounds = array<i64: 1>, scalar_prefetch = 0 : i64, scratch_operands = 0 : i64, tpu.core_type = #tpu.core_type<tc>, window_params = [{transform_indices = @transform_0, window_bounds = array<i64: 16, 64>}, {pipeline_mode = #tpu.pipeline_mode<synchronous>, transform_indices = @transform_1, window_bounds = array<i64: 1, 64>}, {pipeline_mode = #tpu.pipeline_mode<synchronous>, transform_indices = @transform_2, window_bounds = array<i64: 64, 128>}, {pipeline_mode = #tpu.pipeline_mode<synchronous>, transform_indices = @transform_3, window_bounds = array<i64: 1, 128>}, {transform_indices = @transform_4, window_bounds = array<i64: 16, 128>}]} {
    %c0 = arith.constant 0 : index
    %c0_0 = arith.constant 0 : index
    %0 = vector.load %arg1[%c0, %c0_0] : memref<16x64xf32, #tpu.memory_space<vmem>>, vector<16x64xf32>
    %1 = arith.mulf %0, %0 : vector<16x64xf32>
    %cst = arith.constant dense<0.000000e+00> : vector<16xf32>
    %2 = vector.multi_reduction <add>, %1, %cst [1] : vector<16x64xf32> to vector<16xf32>
    %3 = vector.shape_cast %2 : vector<16xf32> to vector<16x1xf32>
    %cst_1 = arith.constant 6.400000e+01 : f32
    %4 = vector.broadcast %cst_1 : f32 to vector<16x1xf32>
    %5 = arith.divf %3, %4 : vector<16x1xf32>
    %cst_2 = arith.constant 9.99999997E-7 : f32
    %6 = vector.broadcast %cst_2 : f32 to vector<16x1xf32>
    %7 = arith.addf %5, %6 : vector<16x1xf32>
    %8 = math.rsqrt %7 : vector<16x1xf32>
    %9 = vector.broadcast %8 : vector<16x1xf32> to vector<16x64xf32>
    %10 = arith.mulf %0, %9 : vector<16x64xf32>
    %c0_3 = arith.constant 0 : index
    %c0_4 = arith.constant 0 : index
    %11 = vector.load %arg2[%c0_3, %c0_4] : memref<1x64xf32, #tpu.memory_space<vmem>>, vector<1x64xf32>
    %12 = vector.broadcast %11 : vector<1x64xf32> to vector<16x64xf32>
    %13 = arith.mulf %10, %12 : vector<16x64xf32>
    %14 = arith.truncf %13 : vector<16x64xf32> to vector<16x64xbf16>
    %c0_5 = arith.constant 0 : index
    %c0_6 = arith.constant 0 : index
    %15 = vector.load %arg3[%c0_5, %c0_6] : memref<64x128xbf16, #tpu.memory_space<vmem>>, vector<64x128xbf16>
    %cst_7 = arith.constant dense<0.000000e+00> : vector<16x128xf32>
    %16 = tpu.matmul %14, %15, %cst_7 {dimension_numbers = #tpu.dot_dimension_numbers<[1], [0], [0], [1], [0, 0, 1, 1], [], []>} : vector<16x64xbf16>, vector<64x128xbf16>, vector<16x128xf32> -> vector<16x128xf32>
    %c0_8 = arith.constant 0 : index
    %c0_9 = arith.constant 0 : index
    %17 = vector.load %arg4[%c0_8, %c0_9] : memref<1x128xf32, #tpu.memory_space<vmem>>, vector<1x128xf32>
    %18 = vector.broadcast %17 : vector<1x128xf32> to vector<16x128xf32>
    %19 = arith.addf %16, %18 : vector<16x128xf32>
    %20 = arith.truncf %19 : vector<16x128xf32> to vector<16x128xbf16>
    %c0_10 = arith.constant 0 : index
    %c0_11 = arith.constant 0 : index
    %21 = vector.load %arg5[%c0_10, %c0_11] : memref<16x128xbf16, #tpu.memory_space<vmem>>, vector<16x128xbf16>
    tpu.vector_store %arg5[%c0_10, %c0_11], %20 {strides = array<i32>} : memref<16x128xbf16, #tpu.memory_space<vmem>>, vector<16x128xbf16>,
    return
  }
  func.func @transform_0(%arg0: i32) -> (i32, i32) {
    %c0_i32 = arith.constant 0 : i32
    %c0_i32_0 = arith.constant 0 : i32
    return %arg0, %c0_i32 : i32, i32
  }
  func.func @transform_1(%arg0: i32) -> (i32, i32) {
    %c0_i32 = arith.constant 0 : i32
    %c0_i32_0 = arith.constant 0 : i32
    %c0_i32_1 = arith.constant 0 : i32
    return %c0_i32, %c0_i32_0 : i32, i32
  }
  func.func @transform_2(%arg0: i32) -> (i32, i32) {
    %c0_i32 = arith.constant 0 : i32
    %c0_i32_0 = arith.constant 0 : i32
    %c0_i32_1 = arith.constant 0 : i32
    return %c0_i32, %c0_i32_0 : i32, i32
  }
  func.func @transform_3(%arg0: i32) -> (i32, i32) {
    %c0_i32 = arith.constant 0 : i32
    %c0_i32_0 = arith.constant 0 : i32
    %c0_i32_1 = arith.constant 0 : i32
    return %c0_i32, %c0_i32_0 : i32, i32
  }
  func.func @transform_4(%arg0: i32) -> (i32, i32) {
    %c0_i32 = arith.constant 0 : i32
    %c0_i32_0 = arith.constant 0 : i32
    return %arg0, %c0_i32 : i32, i32
  }
}

module attributes {stable_mosaic.version = 11 : i64} {
  func.func @_attn_oproj_kernel(%arg0: i32, %arg1: memref<1x8x128xbf16, #tpu.memory_space<vmem>>, %arg2: memref<8x16xf32, #tpu.memory_space<vmem>>, %arg3: memref<8x16xf32, #tpu.memory_space<vmem>>, %arg4: memref<64x64xbf16, #tpu.memory_space<vmem>>, %arg5: memref<1x8x64xf32, #tpu.memory_space<vmem>>, %arg6: memref<1x8x64xf32, #tpu.memory_space<vmem>>) attributes {dimension_semantics = [#tpu.dimension_semantics<parallel>], iteration_bounds = array<i64: 2>, scalar_prefetch = 0 : i64, scratch_operands = 0 : i64, tpu.core_type = #tpu.core_type<tc>, window_params = [{transform_indices = @transform_0, window_bounds = array<i64: 1, 8, 128>}, {pipeline_mode = #tpu.pipeline_mode<synchronous>, transform_indices = @transform_1, window_bounds = array<i64: 8, 16>}, {pipeline_mode = #tpu.pipeline_mode<synchronous>, transform_indices = @transform_2, window_bounds = array<i64: 8, 16>}, {pipeline_mode = #tpu.pipeline_mode<synchronous>, transform_indices = @transform_3, window_bounds = array<i64: 64, 64>}, {transform_indices = @transform_4, window_bounds = array<i64: 1, 8, 64>}, {transform_indices = @transform_5, window_bounds = array<i64: 1, 8, 64>}]} {
    %c0 = arith.constant 0 : index
    %c0_0 = arith.constant 0 : index
    %c0_1 = arith.constant 0 : index
    %0 = vector.load %arg1[%c0, %c0_0, %c0_1] : memref<1x8x128xbf16, #tpu.memory_space<vmem>>, vector<1x8x128xbf16>
    %1 = vector.shape_cast %0 : vector<1x8x128xbf16> to vector<8x128xbf16>
    %2 = arith.extf %1 : vector<8x128xbf16> to vector<8x128xf32>
    %c0_2 = arith.constant 0 : index
    %c0_3 = arith.constant 0 : index
    %3 = vector.load %arg2[%c0_2, %c0_3] : memref<8x16xf32, #tpu.memory_space<vmem>>, vector<8x16xf32>
    %c0_4 = arith.constant 0 : index
    %c0_5 = arith.constant 0 : index
    %4 = vector.load %arg3[%c0_4, %c0_5] : memref<8x16xf32, #tpu.memory_space<vmem>>, vector<8x16xf32>
    %5 = tpu.iota {dimensions = array<i32: 1>} : vector<8x8xi32>
    %6 = tpu.iota {dimensions = array<i32: 0>} : vector<8x8xi32>
    %7 = arith.cmpi sle, %5, %6 : vector<8x8xi32>
    %8 = tpu.concatenate %7, %7 in 0 : vector<8x8xi1>, vector<8x8xi1> -> vector<16x8xi1>
    %9 = tpu.concatenate %3, %3 in 0 : vector<8x16xf32>, vector<8x16xf32> -> vector<16x16xf32>
    %10 = tpu.concatenate %4, %4 in 0 : vector<8x16xf32>, vector<8x16xf32> -> vector<16x16xf32>
    %11 = vector.extract_strided_slice %2 {offsets = [0, 64], sizes = [8, 16], strides = [1, 1]} : vector<8x128xf32> to vector<8x16xf32>
    %12 = vector.extract_strided_slice %2 {offsets = [0, 96], sizes = [8, 16], strides = [1, 1]} : vector<8x128xf32> to vector<8x16xf32>
    %13 = vector.extract_strided_slice %11 {offsets = [0, 8], sizes = [8, 8], strides = [1, 1]} : vector<8x16xf32> to vector<8x8xf32>
    %cst = arith.constant 0.000000e+00 : f32
    %14 = vector.broadcast %cst : f32 to vector<8x8xf32>
    %15 = arith.subf %14, %13 : vector<8x8xf32>
    %16 = vector.extract_strided_slice %11 {offsets = [0, 0], sizes = [8, 8], strides = [1, 1]} : vector<8x16xf32> to vector<8x8xf32>
    %17 = tpu.concatenate %15, %16 in 1 : vector<8x8xf32>, vector<8x8xf32> -> vector<8x16xf32>
    %18 = arith.mulf %11, %3 : vector<8x16xf32>
    %19 = arith.mulf %17, %4 : vector<8x16xf32>
    %20 = arith.addf %18, %19 : vector<8x16xf32>
    %21 = vector.extract_strided_slice %2 {offsets = [0, 0], sizes = [8, 16], strides = [1, 1]} : vector<8x128xf32> to vector<8x16xf32>
    %22 = vector.extract_strided_slice %2 {offsets = [0, 16], sizes = [8, 16], strides = [1, 1]} : vector<8x128xf32> to vector<8x16xf32>
    %23 = tpu.concatenate %21, %22 in 0 : vector<8x16xf32>, vector<8x16xf32> -> vector<16x16xf32>
    %24 = vector.extract_strided_slice %23 {offsets = [0, 8], sizes = [16, 8], strides = [1, 1]} : vector<16x16xf32> to vector<16x8xf32>
    %cst_6 = arith.constant 0.000000e+00 : f32
    %25 = vector.broadcast %cst_6 : f32 to vector<16x8xf32>
    %26 = arith.subf %25, %24 : vector<16x8xf32>
    %27 = vector.extract_strided_slice %23 {offsets = [0, 0], sizes = [16, 8], strides = [1, 1]} : vector<16x16xf32> to vector<16x8xf32>
    %28 = tpu.concatenate %26, %27 in 1 : vector<16x8xf32>, vector<16x8xf32> -> vector<16x16xf32>
    %29 = arith.mulf %23, %9 : vector<16x16xf32>
    %30 = arith.mulf %28, %10 : vector<16x16xf32>
    %31 = arith.addf %29, %30 : vector<16x16xf32>
    %cst_7 = arith.constant dense<0.000000e+00> : vector<16x8xf32>
    %32 = tpu.matmul %31, %20, %cst_7 {dimension_numbers = #tpu.dot_dimension_numbers<[1], [1], [0], [0], [0, 0, 1, 0], [], []>} : vector<16x16xf32>, vector<8x16xf32>, vector<16x8xf32> -> vector<16x8xf32>
    %cst_8 = arith.constant -1.000000e+30 : f32
    %33 = vector.broadcast %cst_8 : f32 to vector<16x8xf32>
    %34 = arith.select %8, %32, %33 : vector<16x8xi1>, vector<16x8xf32>
    %cst_9 = arith.constant dense<0xFF800000> : vector<16xf32>
    %35 = vector.multi_reduction <maximumf>, %34, %cst_9 [1] : vector<16x8xf32> to vector<16xf32>
    %36 = vector.shape_cast %35 : vector<16xf32> to vector<16x1xf32>
    %37 = vector.broadcast %36 : vector<16x1xf32> to vector<16x8xf32>
    %38 = arith.subf %34, %37 : vector<16x8xf32>
    %39 = math.exp %38 : vector<16x8xf32>
    %cst_10 = arith.constant dense<0.000000e+00> : vector<16xf32>
    %40 = vector.multi_reduction <add>, %39, %cst_10 [1] : vector<16x8xf32> to vector<16xf32>
    %41 = vector.shape_cast %40 : vector<16xf32> to vector<16x1xf32>
    %42 = vector.broadcast %41 : vector<16x1xf32> to vector<16x8xf32>
    %43 = arith.divf %39, %42 : vector<16x8xf32>
    %cst_11 = arith.constant dense<0.000000e+00> : vector<16x16xf32>
    %44 = tpu.matmul %43, %12, %cst_11 {dimension_numbers = #tpu.dot_dimension_numbers<[1], [0], [0], [1], [0, 0, 1, 1], [], []>} : vector<16x8xf32>, vector<8x16xf32>, vector<16x16xf32> -> vector<16x16xf32>
    %45 = vector.extract_strided_slice %44 {offsets = [0, 0], sizes = [8, 16], strides = [1, 1]} : vector<16x16xf32> to vector<8x16xf32>
    %46 = vector.extract_strided_slice %44 {offsets = [8, 0], sizes = [8, 16], strides = [1, 1]} : vector<16x16xf32> to vector<8x16xf32>
    %47 = vector.extract_strided_slice %2 {offsets = [0, 80], sizes = [8, 16], strides = [1, 1]} : vector<8x128xf32> to vector<8x16xf32>
    %48 = vector.extract_strided_slice %2 {offsets = [0, 112], sizes = [8, 16], strides = [1, 1]} : vector<8x128xf32> to vector<8x16xf32>
    %49 = vector.extract_strided_slice %47 {offsets = [0, 8], sizes = [8, 8], strides = [1, 1]} : vector<8x16xf32> to vector<8x8xf32>
    %cst_12 = arith.constant 0.000000e+00 : f32
    %50 = vector.broadcast %cst_12 : f32 to vector<8x8xf32>
    %51 = arith.subf %50, %49 : vector<8x8xf32>
    %52 = vector.extract_strided_slice %47 {offsets = [0, 0], sizes = [8, 8], strides = [1, 1]} : vector<8x16xf32> to vector<8x8xf32>
    %53 = tpu.concatenate %51, %52 in 1 : vector<8x8xf32>, vector<8x8xf32> -> vector<8x16xf32>
    %54 = arith.mulf %47, %3 : vector<8x16xf32>
    %55 = arith.mulf %53, %4 : vector<8x16xf32>
    %56 = arith.addf %54, %55 : vector<8x16xf32>
    %57 = vector.extract_strided_slice %2 {offsets = [0, 32], sizes = [8, 16], strides = [1, 1]} : vector<8x128xf32> to vector<8x16xf32>
    %58 = vector.extract_strided_slice %2 {offsets = [0, 48], sizes = [8, 16], strides = [1, 1]} : vector<8x128xf32> to vector<8x16xf32>
    %59 = tpu.concatenate %57, %58 in 0 : vector<8x16xf32>, vector<8x16xf32> -> vector<16x16xf32>
    %60 = vector.extract_strided_slice %59 {offsets = [0, 8], sizes = [16, 8], strides = [1, 1]} : vector<16x16xf32> to vector<16x8xf32>
    %cst_13 = arith.constant 0.000000e+00 : f32
    %61 = vector.broadcast %cst_13 : f32 to vector<16x8xf32>
    %62 = arith.subf %61, %60 : vector<16x8xf32>
    %63 = vector.extract_strided_slice %59 {offsets = [0, 0], sizes = [16, 8], strides = [1, 1]} : vector<16x16xf32> to vector<16x8xf32>
    %64 = tpu.concatenate %62, %63 in 1 : vector<16x8xf32>, vector<16x8xf32> -> vector<16x16xf32>
    %65 = arith.mulf %59, %9 : vector<16x16xf32>
    %66 = arith.mulf %64, %10 : vector<16x16xf32>
    %67 = arith.addf %65, %66 : vector<16x16xf32>
    %cst_14 = arith.constant dense<0.000000e+00> : vector<16x8xf32>
    %68 = tpu.matmul %67, %56, %cst_14 {dimension_numbers = #tpu.dot_dimension_numbers<[1], [1], [0], [0], [0, 0, 1, 0], [], []>} : vector<16x16xf32>, vector<8x16xf32>, vector<16x8xf32> -> vector<16x8xf32>
    %cst_15 = arith.constant -1.000000e+30 : f32
    %69 = vector.broadcast %cst_15 : f32 to vector<16x8xf32>
    %70 = arith.select %8, %68, %69 : vector<16x8xi1>, vector<16x8xf32>
    %cst_16 = arith.constant dense<0xFF800000> : vector<16xf32>
    %71 = vector.multi_reduction <maximumf>, %70, %cst_16 [1] : vector<16x8xf32> to vector<16xf32>
    %72 = vector.shape_cast %71 : vector<16xf32> to vector<16x1xf32>
    %73 = vector.broadcast %72 : vector<16x1xf32> to vector<16x8xf32>
    %74 = arith.subf %70, %73 : vector<16x8xf32>
    %75 = math.exp %74 : vector<16x8xf32>
    %cst_17 = arith.constant dense<0.000000e+00> : vector<16xf32>
    %76 = vector.multi_reduction <add>, %75, %cst_17 [1] : vector<16x8xf32> to vector<16xf32>
    %77 = vector.shape_cast %76 : vector<16xf32> to vector<16x1xf32>
    %78 = vector.broadcast %77 : vector<16x1xf32> to vector<16x8xf32>
    %79 = arith.divf %75, %78 : vector<16x8xf32>
    %cst_18 = arith.constant dense<0.000000e+00> : vector<16x16xf32>
    %80 = tpu.matmul %79, %48, %cst_18 {dimension_numbers = #tpu.dot_dimension_numbers<[1], [0], [0], [1], [0, 0, 1, 1], [], []>} : vector<16x8xf32>, vector<8x16xf32>, vector<16x16xf32> -> vector<16x16xf32>
    %81 = vector.extract_strided_slice %80 {offsets = [0, 0], sizes = [8, 16], strides = [1, 1]} : vector<16x16xf32> to vector<8x16xf32>
    %82 = vector.extract_strided_slice %80 {offsets = [8, 0], sizes = [8, 16], strides = [1, 1]} : vector<16x16xf32> to vector<8x16xf32>
    %83 = tpu.concatenate %45, %46, %81, %82 in 1 : vector<8x16xf32>, vector<8x16xf32>, vector<8x16xf32>, vector<8x16xf32> -> vector<8x64xf32>
    %84 = arith.truncf %83 : vector<8x64xf32> to vector<8x64xbf16>
    %c0_19 = arith.constant 0 : index
    %c0_20 = arith.constant 0 : index
    %85 = vector.load %arg4[%c0_19, %c0_20] : memref<64x64xbf16, #tpu.memory_space<vmem>>, vector<64x64xbf16>
    %cst_21 = arith.constant dense<0.000000e+00> : vector<8x64xf32>
    %86 = tpu.matmul %84, %85, %cst_21 {dimension_numbers = #tpu.dot_dimension_numbers<[1], [0], [0], [1], [0, 0, 1, 1], [], []>} : vector<8x64xbf16>, vector<64x64xbf16>, vector<8x64xf32> -> vector<8x64xf32>
    %c0_22 = arith.constant 0 : index
    %c0_23 = arith.constant 0 : index
    %c0_24 = arith.constant 0 : index
    %87 = vector.load %arg5[%c0_22, %c0_23, %c0_24] : memref<1x8x64xf32, #tpu.memory_space<vmem>>, vector<1x8x64xf32>
    %88 = vector.shape_cast %87 : vector<1x8x64xf32> to vector<8x64xf32>
    %89 = arith.addf %88, %86 : vector<8x64xf32>
    %c0_25 = arith.constant 0 : index
    %c0_26 = arith.constant 0 : index
    %c0_27 = arith.constant 0 : index
    %90 = vector.load %arg6[%c0_25, %c0_26, %c0_27] : memref<1x8x64xf32, #tpu.memory_space<vmem>>, vector<1x8x64xf32>
    %91 = vector.shape_cast %90 : vector<1x8x64xf32> to vector<8x64xf32>
    %92 = vector.shape_cast %89 : vector<8x64xf32> to vector<1x8x64xf32>
    tpu.vector_store %arg6[%c0_25, %c0_26, %c0_27], %92 {strides = array<i32>} : memref<1x8x64xf32, #tpu.memory_space<vmem>>, vector<1x8x64xf32>,
    return
  }
  func.func @transform_0(%arg0: i32) -> (i32, i32, i32) {
    %c0_i32 = arith.constant 0 : i32
    %c0_i32_0 = arith.constant 0 : i32
    %c0_i32_1 = arith.constant 0 : i32
    return %arg0, %c0_i32, %c0_i32_0 : i32, i32, i32
  }
  func.func @transform_1(%arg0: i32) -> (i32, i32) {
    %c0_i32 = arith.constant 0 : i32
    %c0_i32_0 = arith.constant 0 : i32
    %c0_i32_1 = arith.constant 0 : i32
    return %c0_i32, %c0_i32_0 : i32, i32
  }
  func.func @transform_2(%arg0: i32) -> (i32, i32) {
    %c0_i32 = arith.constant 0 : i32
    %c0_i32_0 = arith.constant 0 : i32
    %c0_i32_1 = arith.constant 0 : i32
    return %c0_i32, %c0_i32_0 : i32, i32
  }
  func.func @transform_3(%arg0: i32) -> (i32, i32) {
    %c0_i32 = arith.constant 0 : i32
    %c0_i32_0 = arith.constant 0 : i32
    %c0_i32_1 = arith.constant 0 : i32
    return %c0_i32, %c0_i32_0 : i32, i32
  }
  func.func @transform_4(%arg0: i32) -> (i32, i32, i32) {
    %c0_i32 = arith.constant 0 : i32
    %c0_i32_0 = arith.constant 0 : i32
    %c0_i32_1 = arith.constant 0 : i32
    return %arg0, %c0_i32, %c0_i32_0 : i32, i32, i32
  }
  func.func @transform_5(%arg0: i32) -> (i32, i32, i32) {
    %c0_i32 = arith.constant 0 : i32
    %c0_i32_0 = arith.constant 0 : i32
    %c0_i32_1 = arith.constant 0 : i32
    return %arg0, %c0_i32, %c0_i32_0 : i32, i32, i32
  }
}

module attributes {stable_mosaic.version = 11 : i64} {
  func.func @_mlp_kernel(%arg0: i32, %arg1: memref<16x64xf32, #tpu.memory_space<vmem>>, %arg2: memref<1x64xf32, #tpu.memory_space<vmem>>, %arg3: memref<64x256xbf16, #tpu.memory_space<vmem>>, %arg4: memref<128x64xbf16, #tpu.memory_space<vmem>>, %arg5: memref<16x64xf32, #tpu.memory_space<vmem>>) attributes {dimension_semantics = [#tpu.dimension_semantics<parallel>], iteration_bounds = array<i64: 1>, scalar_prefetch = 0 : i64, scratch_operands = 0 : i64, tpu.core_type = #tpu.core_type<tc>, window_params = [{transform_indices = @transform_0, window_bounds = array<i64: 16, 64>}, {pipeline_mode = #tpu.pipeline_mode<synchronous>, transform_indices = @transform_1, window_bounds = array<i64: 1, 64>}, {pipeline_mode = #tpu.pipeline_mode<synchronous>, transform_indices = @transform_2, window_bounds = array<i64: 64, 256>}, {pipeline_mode = #tpu.pipeline_mode<synchronous>, transform_indices = @transform_3, window_bounds = array<i64: 128, 64>}, {transform_indices = @transform_4, window_bounds = array<i64: 16, 64>}]} {
    %c0 = arith.constant 0 : index
    %c0_0 = arith.constant 0 : index
    %0 = vector.load %arg1[%c0, %c0_0] : memref<16x64xf32, #tpu.memory_space<vmem>>, vector<16x64xf32>
    %1 = arith.mulf %0, %0 : vector<16x64xf32>
    %cst = arith.constant dense<0.000000e+00> : vector<16xf32>
    %2 = vector.multi_reduction <add>, %1, %cst [1] : vector<16x64xf32> to vector<16xf32>
    %3 = vector.shape_cast %2 : vector<16xf32> to vector<16x1xf32>
    %cst_1 = arith.constant 6.400000e+01 : f32
    %4 = vector.broadcast %cst_1 : f32 to vector<16x1xf32>
    %5 = arith.divf %3, %4 : vector<16x1xf32>
    %cst_2 = arith.constant 9.99999997E-7 : f32
    %6 = vector.broadcast %cst_2 : f32 to vector<16x1xf32>
    %7 = arith.addf %5, %6 : vector<16x1xf32>
    %8 = math.rsqrt %7 : vector<16x1xf32>
    %9 = vector.broadcast %8 : vector<16x1xf32> to vector<16x64xf32>
    %10 = arith.mulf %0, %9 : vector<16x64xf32>
    %c0_3 = arith.constant 0 : index
    %c0_4 = arith.constant 0 : index
    %11 = vector.load %arg2[%c0_3, %c0_4] : memref<1x64xf32, #tpu.memory_space<vmem>>, vector<1x64xf32>
    %12 = vector.broadcast %11 : vector<1x64xf32> to vector<16x64xf32>
    %13 = arith.mulf %10, %12 : vector<16x64xf32>
    %14 = arith.truncf %13 : vector<16x64xf32> to vector<16x64xbf16>
    %c0_5 = arith.constant 0 : index
    %c0_6 = arith.constant 0 : index
    %15 = vector.load %arg3[%c0_5, %c0_6] : memref<64x256xbf16, #tpu.memory_space<vmem>>, vector<64x256xbf16>
    %cst_7 = arith.constant dense<0.000000e+00> : vector<16x256xf32>
    %16 = tpu.matmul %14, %15, %cst_7 {dimension_numbers = #tpu.dot_dimension_numbers<[1], [0], [0], [1], [0, 0, 1, 1], [], []>} : vector<16x64xbf16>, vector<64x256xbf16>, vector<16x256xf32> -> vector<16x256xf32>
    %17 = vector.extract_strided_slice %16 {offsets = [0, 0], sizes = [16, 128], strides = [1, 1]} : vector<16x256xf32> to vector<16x128xf32>
    %18 = vector.extract_strided_slice %16 {offsets = [0, 128], sizes = [16, 128], strides = [1, 1]} : vector<16x256xf32> to vector<16x128xf32>
    %19 = arith.negf %17 : vector<16x128xf32>
    %20 = math.exp %19 : vector<16x128xf32>
    %cst_8 = arith.constant 1.000000e+00 : f32
    %21 = vector.broadcast %cst_8 : f32 to vector<16x128xf32>
    %22 = arith.addf %21, %20 : vector<16x128xf32>
    %23 = arith.divf %21, %22 : vector<16x128xf32>
    %24 = arith.mulf %17, %23 : vector<16x128xf32>
    %25 = arith.mulf %24, %18 : vector<16x128xf32>
    %26 = arith.truncf %25 : vector<16x128xf32> to vector<16x128xbf16>
    %c0_9 = arith.constant 0 : index
    %c0_10 = arith.constant 0 : index
    %27 = vector.load %arg4[%c0_9, %c0_10] : memref<128x64xbf16, #tpu.memory_space<vmem>>, vector<128x64xbf16>
    %cst_11 = arith.constant dense<0.000000e+00> : vector<16x64xf32>
    %28 = tpu.matmul %26, %27, %cst_11 {dimension_numbers = #tpu.dot_dimension_numbers<[1], [0], [0], [1], [0, 0, 1, 1], [], []>} : vector<16x128xbf16>, vector<128x64xbf16>, vector<16x64xf32> -> vector<16x64xf32>
    %29 = arith.addf %0, %28 : vector<16x64xf32>
    %c0_12 = arith.constant 0 : index
    %c0_13 = arith.constant 0 : index
    %30 = vector.load %arg5[%c0_12, %c0_13] : memref<16x64xf32, #tpu.memory_space<vmem>>, vector<16x64xf32>
    tpu.vector_store %arg5[%c0_12, %c0_13], %29 {strides = array<i32>} : memref<16x64xf32, #tpu.memory_space<vmem>>, vector<16x64xf32>,
    return
  }
  func.func @transform_0(%arg0: i32) -> (i32, i32) {
    %c0_i32 = arith.constant 0 : i32
    %c0_i32_0 = arith.constant 0 : i32
    return %arg0, %c0_i32 : i32, i32
  }
  func.func @transform_1(%arg0: i32) -> (i32, i32) {
    %c0_i32 = arith.constant 0 : i32
    %c0_i32_0 = arith.constant 0 : i32
    %c0_i32_1 = arith.constant 0 : i32
    return %c0_i32, %c0_i32_0 : i32, i32
  }
  func.func @transform_2(%arg0: i32) -> (i32, i32) {
    %c0_i32 = arith.constant 0 : i32
    %c0_i32_0 = arith.constant 0 : i32
    %c0_i32_1 = arith.constant 0 : i32
    return %c0_i32, %c0_i32_0 : i32, i32
  }
  func.func @transform_3(%arg0: i32) -> (i32, i32) {
    %c0_i32 = arith.constant 0 : i32
    %c0_i32_0 = arith.constant 0 : i32
    %c0_i32_1 = arith.constant 0 : i32
    return %c0_i32, %c0_i32_0 : i32, i32
  }
  func.func @transform_4(%arg0: i32) -> (i32, i32) {
    %c0_i32 = arith.constant 0 : i32
    %c0_i32_0 = arith.constant 0 : i32
    return %arg0, %c0_i32 : i32, i32
  }
}

module attributes {stable_mosaic.version = 11 : i64} {
  func.func @_head_ce_kernel(%arg0: i32, %arg1: i32, %arg2: memref<16x64xf32, #tpu.memory_space<vmem>>, %arg3: memref<1x64xf32, #tpu.memory_space<vmem>>, %arg4: memref<64x128xbf16, #tpu.memory_space<vmem>>, %arg5: memref<16x1xi32, #tpu.memory_space<vmem>>, %arg6: memref<16x1xf32, #tpu.memory_space<vmem>>, %arg7: memref<16x1xf32, #tpu.memory_space<vmem>>, %arg8: memref<16x1xf32, #tpu.memory_space<vmem>>, %arg9: memref<16x1xf32, #tpu.memory_space<vmem>>) attributes {dimension_semantics = [#tpu.dimension_semantics<parallel>, #tpu.dimension_semantics<arbitrary>], iteration_bounds = array<i64: 1, 2>, scalar_prefetch = 0 : i64, scratch_operands = 3 : i64, tpu.core_type = #tpu.core_type<tc>, window_params = [{transform_indices = @transform_0, window_bounds = array<i64: 16, 64>}, {pipeline_mode = #tpu.pipeline_mode<synchronous>, transform_indices = @transform_1, window_bounds = array<i64: 1, 64>}, {transform_indices = @transform_2, window_bounds = array<i64: 64, 128>}, {transform_indices = @transform_3, window_bounds = array<i64: 16, 1>}, {transform_indices = @transform_4, window_bounds = array<i64: 16, 1>}]} {
    %c0_i32 = arith.constant 0 : i32
    %0 = arith.cmpi eq, %arg1, %c0_i32 : i32
    %1 = arith.extui %0 : i1 to i32
    %c0_i32_0 = arith.constant 0 : i32
    %2 = arith.cmpi ne, %1, %c0_i32_0 : i32
    scf.if %2 {
      %cst_30 = arith.constant 0xFF800000 : f32
      %54 = vector.broadcast %cst_30 : f32 to vector<16x1xf32>
      %c0_31 = arith.constant 0 : index
      %c0_32 = arith.constant 0 : index
      %55 = vector.load %arg7[%c0_31, %c0_32] : memref<16x1xf32, #tpu.memory_space<vmem>>, vector<16x1xf32>
      tpu.vector_store %arg7[%c0_31, %c0_32], %54 {strides = array<i32>} : memref<16x1xf32, #tpu.memory_space<vmem>>, vector<16x1xf32>,
      %cst_33 = arith.constant 0.000000e+00 : f32
      %56 = vector.broadcast %cst_33 : f32 to vector<16x1xf32>
      %c0_34 = arith.constant 0 : index
      %c0_35 = arith.constant 0 : index
      %57 = vector.load %arg8[%c0_34, %c0_35] : memref<16x1xf32, #tpu.memory_space<vmem>>, vector<16x1xf32>
      tpu.vector_store %arg8[%c0_34, %c0_35], %56 {strides = array<i32>} : memref<16x1xf32, #tpu.memory_space<vmem>>, vector<16x1xf32>,
      %cst_36 = arith.constant 0.000000e+00 : f32
      %58 = vector.broadcast %cst_36 : f32 to vector<16x1xf32>
      %c0_37 = arith.constant 0 : index
      %c0_38 = arith.constant 0 : index
      %59 = vector.load %arg9[%c0_37, %c0_38] : memref<16x1xf32, #tpu.memory_space<vmem>>, vector<16x1xf32>
      tpu.vector_store %arg9[%c0_37, %c0_38], %58 {strides = array<i32>} : memref<16x1xf32, #tpu.memory_space<vmem>>, vector<16x1xf32>,
    } else {
    }
    %c0 = arith.constant 0 : index
    %c0_1 = arith.constant 0 : index
    %3 = vector.load %arg2[%c0, %c0_1] : memref<16x64xf32, #tpu.memory_space<vmem>>, vector<16x64xf32>
    %4 = arith.mulf %3, %3 : vector<16x64xf32>
    %cst = arith.constant dense<0.000000e+00> : vector<16xf32>
    %5 = vector.multi_reduction <add>, %4, %cst [1] : vector<16x64xf32> to vector<16xf32>
    %6 = vector.shape_cast %5 : vector<16xf32> to vector<16x1xf32>
    %cst_2 = arith.constant 6.400000e+01 : f32
    %7 = vector.broadcast %cst_2 : f32 to vector<16x1xf32>
    %8 = arith.divf %6, %7 : vector<16x1xf32>
    %cst_3 = arith.constant 9.99999997E-7 : f32
    %9 = vector.broadcast %cst_3 : f32 to vector<16x1xf32>
    %10 = arith.addf %8, %9 : vector<16x1xf32>
    %11 = math.rsqrt %10 : vector<16x1xf32>
    %12 = vector.broadcast %11 : vector<16x1xf32> to vector<16x64xf32>
    %13 = arith.mulf %3, %12 : vector<16x64xf32>
    %c0_4 = arith.constant 0 : index
    %c0_5 = arith.constant 0 : index
    %14 = vector.load %arg3[%c0_4, %c0_5] : memref<1x64xf32, #tpu.memory_space<vmem>>, vector<1x64xf32>
    %15 = vector.broadcast %14 : vector<1x64xf32> to vector<16x64xf32>
    %16 = arith.mulf %13, %15 : vector<16x64xf32>
    %17 = arith.truncf %16 : vector<16x64xf32> to vector<16x64xbf16>
    %c0_6 = arith.constant 0 : index
    %c0_7 = arith.constant 0 : index
    %18 = vector.load %arg4[%c0_6, %c0_7] : memref<64x128xbf16, #tpu.memory_space<vmem>>, vector<64x128xbf16>
    %cst_8 = arith.constant dense<0.000000e+00> : vector<16x128xf32>
    %19 = tpu.matmul %17, %18, %cst_8 {dimension_numbers = #tpu.dot_dimension_numbers<[1], [0], [0], [1], [0, 0, 1, 1], [], []>} : vector<16x64xbf16>, vector<64x128xbf16>, vector<16x128xf32> -> vector<16x128xf32>
    %c0_9 = arith.constant 0 : index
    %c0_10 = arith.constant 0 : index
    %20 = vector.load %arg5[%c0_9, %c0_10] : memref<16x1xi32, #tpu.memory_space<vmem>>, vector<16x1xi32>
    %21 = tpu.iota {dimensions = array<i32: 1>} : vector<16x128xi32>
    %c128_i32 = arith.constant 128 : i32
    %22 = arith.muli %arg1, %c128_i32 : i32
    %23 = vector.broadcast %22 : i32 to vector<16x128xi32>
    %24 = arith.addi %21, %23 : vector<16x128xi32>
    %c0_11 = arith.constant 0 : index
    %c0_12 = arith.constant 0 : index
    %25 = vector.load %arg9[%c0_11, %c0_12] : memref<16x1xf32, #tpu.memory_space<vmem>>, vector<16x1xf32>
    %26 = vector.broadcast %20 : vector<16x1xi32> to vector<16x128xi32>
    %27 = arith.cmpi eq, %24, %26 : vector<16x128xi32>
    %cst_13 = arith.constant 0.000000e+00 : f32
    %28 = vector.broadcast %cst_13 : f32 to vector<16x128xf32>
    %29 = arith.select %27, %19, %28 : vector<16x128xi1>, vector<16x128xf32>
    %cst_14 = arith.constant dense<0.000000e+00> : vector<16xf32>
    %30 = vector.multi_reduction <add>, %29, %cst_14 [1] : vector<16x128xf32> to vector<16xf32>
    %31 = vector.shape_cast %30 : vector<16xf32> to vector<16x1xf32>
    %32 = arith.addf %25, %31 : vector<16x1xf32>
    %c0_15 = arith.constant 0 : index
    %c0_16 = arith.constant 0 : index
    %33 = vector.load %arg9[%c0_15, %c0_16] : memref<16x1xf32, #tpu.memory_space<vmem>>, vector<16x1xf32>
    tpu.vector_store %arg9[%c0_15, %c0_16], %32 {strides = array<i32>} : memref<16x1xf32, #tpu.memory_space<vmem>>, vector<16x1xf32>,
    %c0_17 = arith.constant 0 : index
    %c0_18 = arith.constant 0 : index
    %34 = vector.load %arg7[%c0_17, %c0_18] : memref<16x1xf32, #tpu.memory_space<vmem>>, vector<16x1xf32>
    %cst_19 = arith.constant dense<0xFF800000> : vector<16xf32>
    %35 = vector.multi_reduction <maximumf>, %19, %cst_19 [1] : vector<16x128xf32> to vector<16xf32>
    %36 = vector.shape_cast %35 : vector<16xf32> to vector<16x1xf32>
    %37 = arith.maximumf %34, %36 : vector<16x1xf32>
    %c0_20 = arith.constant 0 : index
    %c0_21 = arith.constant 0 : index
    %38 = vector.load %arg8[%c0_20, %c0_21] : memref<16x1xf32, #tpu.memory_space<vmem>>, vector<16x1xf32>
    %c0_22 = arith.constant 0 : index
    %c0_23 = arith.constant 0 : index
    %39 = vector.load %arg7[%c0_22, %c0_23] : memref<16x1xf32, #tpu.memory_space<vmem>>, vector<16x1xf32>
    %40 = arith.subf %39, %37 : vector<16x1xf32>
    %41 = math.exp %40 : vector<16x1xf32>
    %42 = arith.mulf %38, %41 : vector<16x1xf32>
    %43 = vector.broadcast %37 : vector<16x1xf32> to vector<16x128xf32>
    %44 = arith.subf %19, %43 : vector<16x128xf32>
    %45 = math.exp %44 : vector<16x128xf32>
    %cst_24 = arith.constant dense<0.000000e+00> : vector<16xf32>
    %46 = vector.multi_reduction <add>, %45, %cst_24 [1] : vector<16x128xf32> to vector<16xf32>
    %47 = vector.shape_cast %46 : vector<16xf32> to vector<16x1xf32>
    %48 = arith.addf %42, %47 : vector<16x1xf32>
    %c0_25 = arith.constant 0 : index
    %c0_26 = arith.constant 0 : index
    %49 = vector.load %arg8[%c0_25, %c0_26] : memref<16x1xf32, #tpu.memory_space<vmem>>, vector<16x1xf32>
    tpu.vector_store %arg8[%c0_25, %c0_26], %48 {strides = array<i32>} : memref<16x1xf32, #tpu.memory_space<vmem>>, vector<16x1xf32>,
    %c0_27 = arith.constant 0 : index
    %c0_28 = arith.constant 0 : index
    %50 = vector.load %arg7[%c0_27, %c0_28] : memref<16x1xf32, #tpu.memory_space<vmem>>, vector<16x1xf32>
    tpu.vector_store %arg7[%c0_27, %c0_28], %37 {strides = array<i32>} : memref<16x1xf32, #tpu.memory_space<vmem>>, vector<16x1xf32>,
    %c1_i32 = arith.constant 1 : i32
    %51 = arith.cmpi eq, %arg1, %c1_i32 : i32
    %52 = arith.extui %51 : i1 to i32
    %c0_i32_29 = arith.constant 0 : i32
    %53 = arith.cmpi ne, %52, %c0_i32_29 : i32
    scf.if %53 {
      %c-100_i32 = arith.constant -100 : i32
      %54 = vector.broadcast %c-100_i32 : i32 to vector<16x1xi32>
      %55 = arith.cmpi ne, %20, %54 : vector<16x1xi32>
      %56 = arith.extui %55 : vector<16x1xi1> to vector<16x1xi32>
      %57 = arith.sitofp %56 : vector<16x1xi32> to vector<16x1xf32>
      %c0_30 = arith.constant 0 : index
      %c0_31 = arith.constant 0 : index
      %58 = vector.load %arg7[%c0_30, %c0_31] : memref<16x1xf32, #tpu.memory_space<vmem>>, vector<16x1xf32>
      %c0_32 = arith.constant 0 : index
      %c0_33 = arith.constant 0 : index
      %59 = vector.load %arg8[%c0_32, %c0_33] : memref<16x1xf32, #tpu.memory_space<vmem>>, vector<16x1xf32>
      %60 = math.log %59 : vector<16x1xf32>
      %61 = arith.addf %58, %60 : vector<16x1xf32>
      %c0_34 = arith.constant 0 : index
      %c0_35 = arith.constant 0 : index
      %62 = vector.load %arg9[%c0_34, %c0_35] : memref<16x1xf32, #tpu.memory_space<vmem>>, vector<16x1xf32>
      %63 = arith.subf %61, %62 : vector<16x1xf32>
      %64 = arith.mulf %63, %57 : vector<16x1xf32>
      %c0_36 = arith.constant 0 : index
      %c0_37 = arith.constant 0 : index
      %65 = vector.load %arg6[%c0_36, %c0_37] : memref<16x1xf32, #tpu.memory_space<vmem>>, vector<16x1xf32>
      tpu.vector_store %arg6[%c0_36, %c0_37], %64 {strides = array<i32>} : memref<16x1xf32, #tpu.memory_space<vmem>>, vector<16x1xf32>,
    } else {
    }
    return
  }
  func.func @transform_0(%arg0: i32, %arg1: i32) -> (i32, i32) {
    %c0_i32 = arith.constant 0 : i32
    %c0_i32_0 = arith.constant 0 : i32
    return %arg0, %c0_i32 : i32, i32
  }
  func.func @transform_1(%arg0: i32, %arg1: i32) -> (i32, i32) {
    %c0_i32 = arith.constant 0 : i32
    %c0_i32_0 = arith.constant 0 : i32
    %c0_i32_1 = arith.constant 0 : i32
    return %c0_i32, %c0_i32_0 : i32, i32
  }
  func.func @transform_2(%arg0: i32, %arg1: i32) -> (i32, i32) {
    %c0_i32 = arith.constant 0 : i32
    %c0_i32_0 = arith.constant 0 : i32
    return %c0_i32, %arg1 : i32, i32
  }
  func.func @transform_3(%arg0: i32, %arg1: i32) -> (i32, i32) {
    %c0_i32 = arith.constant 0 : i32
    %c0_i32_0 = arith.constant 0 : i32
    return %arg0, %c0_i32 : i32, i32
  }
  func.func @transform_4(%arg0: i32, %arg1: i32) -> (i32, i32) {
    %c0_i32 = arith.constant 0 : i32
    %c0_i32_0 = arith.constant 0 : i32
    return %arg0, %c0_i32 : i32, i32
  }
}

</mosaic_0001>

<bundles_post_ra>
// kernel: forward.7
= control target key start
LH: loop header
LB: loop body
LE: loop exit
PB: predicated region body
PF: predicated region fallthrough
CT: control target
= control target key end

     0   :  { %vm22_vm0 = vcmask 523264   ;;  %v188_v7 = vmov 0.0   ;;  %vm189_vm1 = vmmov 0   ;;  %s245_s0 = inlined_call_operand.vmem [shape: f32[16,64], index: 0, kind: input, shape index: {}]   ;;  %s246_s2 = inlined_call_operand.vmem [shape: bf16[64,128], index: 2, kind: input, shape index: {}]   ;;  %s247_s1 = inlined_call_operand.vmem [shape: f32[1,64], index: 1, kind: input, shape index: {}]   ;;  %s248_s3 = inlined_call_operand.vmem [shape: f32[1,128], index: 3, kind: input, shape index: {}]   ;;  %s249_s4 = inlined_call_operand.vmem [shape: bf16[16,128], index: 4, kind: output, shape index: {}]  }
   0x1   :  { %v18_v0 = vld [vmem:[%s245_s0] sm:$0xff]  ;;  %v19_v1 = vld [vmem:[%s245_s0 + $0x8] sm:$0xff]  ;;  %166 = vmatprep.subr.bf16.mxu0 %v188_v7  ;;  %174 = vmatprep.mubr.msk.bf16.mxu0 %vm189_vm1, %v188_v7  ;;  %v182_v9 = vld [vmem:[%s246_s2 + $0x10] sm:$0xff]  }
   0x2   :  { %v20_v2 = vmul.f32 %v18_v0, %v18_v0  ;;  %v21_v3 = vmul.f32 %v19_v1, %v19_v1  ;;  %v180_v6 = vld [vmem:[%s246_s2] sm:$0xff]   ;;  %v181_v8 = vld [vmem:[%s246_s2 + $0x8] sm:$0xff]   ;;  %v183_v10 = vld [vmem:[%s246_s2 + $0x18] sm:$0xff]  }
   0x3   :  { %167 = vmatpush3.bf16.msra.mxu0 %v180_v6  ;;  %v145_v20 = vld [vmem:[%s247_s1] ss:$0 sm:$0xff] }
   0x4   :  { %v23_v4 = vsel %vm22_vm0, %v20_v2, 0.0  ;;  %v26_v5 = vsel %vm22_vm0, %v21_v3, 0.0  ;;  %168 = vmatprep.subr.bf16.mxu0 %v188_v7  ;;  %v146_v25 = vld [vmem:[%s248_s3] ss:$0 sm:$0xff] }
   0x5   :  { %24 = vadd.xlane.f32.xlu0 %v23_v4 }
   0x7   :  { %169 = vmatpush3.bf16.msra.mxu0 %v181_v8 }
   0x8   :  { %170 = vmatprep.subr.bf16.mxu0 %v188_v7 }
   0x9   :  { %27 = vadd.xlane.f32.xlu0 %v26_v5 }
   0xb   :  { %171 = vmatpush3.bf16.msra.mxu0 %v182_v9 }
   0xc   :  { %172 = vmatprep.subr.bf16.mxu0 %v188_v7 }
   0xf   :  { %173 = vmatpush3.bf16.msra.mxu0 %v183_v10 }
  0x92   :  { %v25_v11 = vpop.xlane.xlu0 %24 }
  0x93   :  { %v30_v12 = vmul.f32 0.015625, %v25_v11 }
  0x95   :  { %v32_v13 = vadd.f32 1e-06, %v30_v12 }
  0x96   :  { %v28_v14 = vpop.xlane.xlu0 %27 }
  0x97   :  { %184 = vrsqrt.f32 %v32_v13  ;;  %v31_v15 = vmul.f32 0.015625, %v28_v14 }
  0x99   :  { %v33_v16 = vadd.f32 1e-06, %v31_v15 }
  0x9b   :  { %186 = vrsqrt.f32 %v33_v16 }
  0xa1   :  { %v185_v17 = vpop.eup %184 }
  0xa2   :  { %v36_v18 = vmul.f32 %v185_v17, %v18_v0 }
  0xa4   :  { %v45_v22 = vmul.f32 %v145_v20, %v36_v18 }
  0xa5   :  { %v187_v19 = vpop.eup %186 }
  0xa6   :  { %v37_v21 = vmul.f32 %v187_v19, %v19_v1 }
  0xa8   :  { %v46_v23 = vmul.f32 %v145_v20, %v37_v21 }
  0xaa   :  { %v47_v24 = vpack.c.bf16 %v46_v23, %v45_v22 }
  0xac   :  { %175 = vmatmul.mubr.msk.bf16.vlgmr.msra.gmra.mrb[0].mxu0 %vm22_vm0, %v47_v24 }
 0x17f   :  { %v124_v26 = vpop.f32.mrb[0].mxu0 }
 0x180   :  { %v176_v27 = vpop.f32.mrb[1].mxu0  ;;  %v125_v29 = vadd.f32 %v146_v25, %v124_v26 }
 0x181   :  { %v127_v28 = vpop.f32.mrb[2].mxu0 }
 0x182   :  { %v128_v30 = vadd.f32 %v146_v25, %v127_v28  ;;  %v177_v31 = vpop.f32.mrb[3].mxu0 }
 0x184   :  { %v159_v32 = vpack.c.bf16 %v128_v30, %v125_v29 }
 0x186   :  { %160 = vst [vmem:[%s249_s4] sm:$0xff] %v159_v32  }

// kernel: forward.9
= control target key start
LH: loop header
LB: loop body
LE: loop exit
PB: predicated region body
PF: predicated region fallthrough
CT: control target
= control target key end

     0   :  { %vm22_vm0 = vcmask 523264   ;;  %v356_v9 = vmov 0   ;;  %v357_v30 = vmov 0.0   ;;  %vm358_vm1 = vmmov 0   ;;  %s464_s0 = inlined_call_operand.vmem [shape: f32[16,64], index: 0, kind: input, shape index: {}]   ;;  %s465_s2 = inlined_call_operand.vmem [shape: bf16[64,256], index: 2, kind: input, shape index: {}]   ;;  %s466_s1 = inlined_call_operand.vmem [shape: f32[1,64], index: 1, kind: input, shape index: {}]   ;;  %s467_s3 = inlined_call_operand.vmem [shape: bf16[128,64], index: 3, kind: input, shape index: {}]   ;;  %s468_s4 = inlined_call_operand.vmem [shape: f32[16,64], index: 4, kind: output, shape index: {}]  }
   0x1   :  { %v387_v0 = vld [vmem:[%s464_s0] sm:$0xff]  ;;  %v392_v1 = vld [vmem:[%s464_s0 + $0x8] sm:$0xff]  ;;  %v327_v8 = vld [vmem:[%s465_s2 + $0x14] ss:$8 sps:$4 sm:$0xff]   ;;  %131 = vmatprep.mubr.bf16.mxu0 %v356_v9  ;;  %301 = vmatprep.subr.bf16.mxu1 %v357_v30 }
   0x2   :  { %v20_v2 = vmul.f32 %v387_v0, %v387_v0  ;;  %v21_v3 = vmul.f32 %v392_v1, %v392_v1  ;;  %v324_v6 = vld [vmem:[%s465_s2 + $0x4] ss:$8 sps:$4 sm:$0xff]   ;;  %v326_v7 = vld [vmem:[%s465_s2] ss:$8 sps:$4 sm:$0xff]   ;;  %v329_v10 = vld [vmem:[%s465_s2 + $0x10] ss:$8 sps:$4 sm:$0xff]   ;;  %317 = vmatprep.mubr.msk.bf16.mxu1 %vm358_vm1, %v357_v30 }
   0x3   :  { %99 = vmatprep.subr.bf16.mxu0 %v324_v6  ;;  %v330_v11 = vld [vmem:[%s465_s2 + $0x24] ss:$8 sps:$4 sm:$0xff]   ;;  %v332_v12 = vld [vmem:[%s465_s2 + $0x20] ss:$8 sps:$4 sm:$0xff]   ;;  %v333_v13 = vld [vmem:[%s465_s2 + $0x34] ss:$8 sps:$4 sm:$0xff]  }
   0x4   :  { %v23_v4 = vsel %vm22_vm0, %v20_v2, 0.0  ;;  %v26_v5 = vsel %vm22_vm0, %v21_v3, 0.0  ;;  %100 = vmatpush1.bf16.msra.mxu0 %v326_v7  ;;  %v335_v14 = vld [vmem:[%s465_s2 + $0x30] ss:$8 sps:$4 sm:$0xff]   ;;  %v272_v24 = vld [vmem:[%s466_s1] ss:$0 sm:$0xff] }
   0x5   :  { %24 = vadd.xlane.f32.xlu0 %v23_v4  ;;  %101 = vmatprep.subr.bf16.mxu0 %v327_v8  ;;  %v336_v29 = vld [vmem:[%s467_s3] sm:$0xff]   ;;  %v337_v31 = vld [vmem:[%s467_s3 + $0x8] sm:$0xff]   ;;  %v338_v32 = vld [vmem:[%s467_s3 + $0x10] sm:$0xff]  }
   0x6   :  { %302 = vmatpush3.bf16.msra.mxu1 %v336_v29  ;;  %v339_v33 = vld [vmem:[%s467_s3 + $0x18] sm:$0xff]   ;;  %v340_v34 = vld [vmem:[%s467_s3 + $0x20] sm:$0xff]   ;;  %v341_v35 = vld [vmem:[%s467_s3 + $0x28] sm:$0xff]  }
   0x7   :  { %303 = vmatprep.subr.bf16.mxu1 %v357_v30  ;;  %v342_v36 = vld [vmem:[%s467_s3 + $0x30] sm:$0xff]   ;;  %v343_v37 = vld [vmem:[%s467_s3 + $0x38] sm:$0xff]  }
   0x8   :  { %102 = vmatpush1.bf16.msra.mxu0 %v329_v10 }
   0x9   :  { %27 = vadd.xlane.f32.xlu0 %v26_v5  ;;  %103 = vmatprep.subr.bf16.mxu0 %v330_v11 }
   0xa   :  { %304 = vmatpush3.bf16.msra.mxu1 %v337_v31 }
   0xb   :  { %305 = vmatprep.subr.bf16.mxu1 %v357_v30 }
   0xc   :  { %104 = vmatpush1.bf16.msra.mxu0 %v332_v12 }
   0xd   :  { %105 = vmatprep.subr.bf16.mxu0 %v333_v13 }
   0xe   :  { %306 = vmatpush3.bf16.msra.mxu1 %v338_v32 }
   0xf   :  { %307 = vmatprep.subr.bf16.mxu1 %v357_v30 }
  0x10   :  { %106 = vmatpush1.bf16.msra.mxu0 %v335_v14 }
  0x12   :  { %308 = vmatpush3.bf16.msra.mxu1 %v339_v33 }
  0x13   :  { %309 = vmatprep.subr.bf16.mxu1 %v357_v30 }
  0x16   :  { %310 = vmatpush3.bf16.msra.mxu1 %v340_v34 }
  0x17   :  { %311 = vmatprep.subr.bf16.mxu1 %v357_v30 }
  0x1a   :  { %312 = vmatpush3.bf16.msra.mxu1 %v341_v35 }
  0x1b   :  { %313 = vmatprep.subr.bf16.mxu1 %v357_v30 }
  0x1e   :  { %314 = vmatpush3.bf16.msra.mxu1 %v342_v36 }
  0x1f   :  { %315 = vmatprep.subr.bf16.mxu1 %v357_v30 }
  0x22   :  { %316 = vmatpush3.bf16.msra.mxu1 %v343_v37 }
  0x92   :  { %v25_v15 = vpop.xlane.xlu0 %24 }
  0x93   :  { %v30_v16 = vmul.f32 0.015625, %v25_v15 }
  0x95   :  { %v32_v17 = vadd.f32 1e-06, %v30_v16 }
  0x96   :  { %v28_v18 = vpop.xlane.xlu0 %27 }
  0x97   :  { %344 = vrsqrt.f32 %v32_v17  ;;  %v31_v19 = vmul.f32 0.015625, %v28_v18 }
  0x99   :  { %v33_v20 = vadd.f32 1e-06, %v31_v19 }
  0x9b   :  { %346 = vrsqrt.f32 %v33_v20 }
  0xa1   :  { %v345_v21 = vpop.eup %344 }
  0xa2   :  { %v36_v22 = vmul.f32 %v345_v21, %v387_v0 }
  0xa4   :  { %v45_v26 = vmul.f32 %v272_v24, %v36_v22 }
  0xa5   :  { %v347_v23 = vpop.eup %346 }
  0xa6   :  { %v37_v25 = vmul.f32 %v347_v23, %v392_v1 }
  0xa8   :  { %v46_v27 = vmul.f32 %v272_v24, %v37_v25 }
  0xaa   :  { %v47_v28 = vpack.c.bf16 %v46_v27, %v45_v26 }
  0xac   :  { %281 = vmatmul.mubr.msk.bf16.vlgmr.msra.gmra.mrb[0].mxu0 %vm22_vm0, %v47_v28 }
 0x17f   :  { %v133_v38 = vpop.f32.mrb[0].mxu0 }
 0x180   :  { %v282_v39 = vmul.f32 -1.442695, %v133_v38  ;;  %v135_v40 = vpop.f32.mrb[1].mxu0 }
 0x181   :  { %v137_v41 = vpop.f32.mrb[2].mxu0 }
 0x182   :  { %348 = vpow2.f32 %v282_v39  ;;  %v283_v42 = vmul.f32 -1.442695, %v137_v41  ;;  %v139_v43 = vpop.f32.mrb[3].mxu0 }
 0x184   :  { %350 = vpow2.f32 %v283_v42 }
 0x18c   :  { %v349_v44 = vpop.eup %348 }
 0x18d   :  { %v148_v45 = vadd.f32 1.0, %v349_v44 }
 0x18e   :  { %v351_v46 = vpop.eup %350 }
 0x18f   :  { %352 = vrcp.f32 %v148_v45  ;;  %v149_v47 = vadd.f32 1.0, %v351_v46 }
 0x191   :  { %354 = vrcp.f32 %v149_v47 }
 0x199   :  { %v353_v48 = vpop.eup %352 }
 0x19a   :  { %v154_v49 = vmul.f32 %v353_v48, %v133_v38 }
 0x19b   :  { %v355_v50 = vpop.eup %354 }
 0x19c   :  { %v156_v51 = vmul.f32 %v154_v49, %v135_v40  ;;  %v155_v52 = vmul.f32 %v355_v50, %v137_v41 }
 0x19e   :  { %v157_v53 = vmul.f32 %v155_v52, %v139_v43 }
 0x1a0   :  { %v158_v54 = vpack.c.bf16 %v157_v53, %v156_v51 }
 0x1a2   :  { %318 = vmatmul.mubr.bf16.vlgmr.msra.gmra.mrb[0].mxu1 %v158_v54 }
 0x275   :  { %v257_v55 = vpop.f32.mrb[0].mxu1 }
 0x276   :  { %v264_v56 = vadd.f32 %v257_v55, %v387_v0  ;;  %v319_v57 = vpop.f32.mrb[1].mxu1 }
 0x277   :  { %v260_v58 = vpop.f32.mrb[2].mxu1 }
 0x278   :  { %266 = vst.msk [vmem:[%s468_s4] sm:$0xff] %vm22_vm0, %v264_v56  ;;  %v265_v59 = vadd.f32 %v260_v58, %v392_v1  ;;  %v320_v60 = vpop.f32.mrb[3].mxu1 }
 0x27a   :  { %267 = vst.msk [vmem:[%s468_s4 + $0x8] sm:$0xff] %vm22_vm0, %v265_v59 }

// kernel: forward.8
= control target key start
LH: loop header
LB: loop body
LE: loop exit
PB: predicated region body
PF: predicated region fallthrough
CT: control target
= control target key end

     0   :  { %s1079_s18 = smov 0   ;;  %s1212_s0 = inlined_call_operand.vmem [shape: bf16[2,8,128], index: 0, kind: input, shape index: {}]   ;;  %s1213_s1 = inlined_call_operand.vmem [shape: f32[8,16], index: 1, kind: input, shape index: {}]   ;;  %s1214_s2 = inlined_call_operand.vmem [shape: f32[8,16], index: 2, kind: input, shape index: {}]   ;;  %s1215_s3 = inlined_call_operand.vmem [shape: bf16[64,64], index: 3, kind: input, shape index: {}]   ;;  %s1216_s4 = inlined_call_operand.vmem [shape: f32[2,8,64], index: 4, kind: input, shape index: {}]   ;;  %s1217_s5 = inlined_call_operand.vmem [shape: f32[2,8,64], index: 5, kind: output, shape index: {}]  }
   0x1 LB: > { %s897_s19 = sadd.s32 4294967295, %s1031_s18   ;;  %p901_p0 = scmp.ge.s32.totalorder %s1031_s18, 1  ;;  %s1031_s18 = sphi %s1079_s18, %s15_s18  }
   0x2   : > { %p195_p1 = scmp.lt.s32.totalorder %s1031_s18, 3 }
   0x4   : > { %p196_p2 = pnand %p901_p0, %p195_p1 }
   0x5   : > { %p225_p3 = scmp.lt.s32.totalorder (!%p196_p2), %s897_s19, 1  ;;  %v1090_v0 = vld [vmem:[%s1213_s1] sm:$0xff] (!%p196_p2)  ;;  %s1033_s22 = smov (!%p196_p2), 64   ;;  %vm256_vm0 = vcmask (!%p196_p2), 64512   ;;  %vm297_vm1 = vcmask (!%p196_p2), 130048   ;;  %v242_v30 = vlaneseq (!%p196_p2)  ;;  %vm1048_vm3 = vmmov (!%p196_p2), 0  }
   0x6   : > { %199 = sbr.rel (%p196_p2) target bundleno = 2016 (0x7e0), region = 40  ;;  %259 = vrot.lane.b32.xlu1 (!%p196_p2), %v1090_v0, %s1033_s22  ;;  %s1034_s27 = smov (!%p196_p2), 112   ;;  %v1112_v8 = vld [vmem:[%s1214_s2] sm:$0xff] (!%p196_p2)  ;;  %vm748_vm4 = vcmask (!%p196_p2), 261120   ;;  %vm750_vm5 = vcmask (!%p196_p2), 392192   ;;  %vm785_vm6 = vcmask (!%p196_p2), 523264  }
   0x7   : > { %s1035_s28 = smov (!%p196_p2), 56   ;;  %s1036_s29 = smov (!%p196_p2), 120   ;;  %v1135_v31 = vand.u32 (!%p196_p2), 127, %v242_v30  ;;  %v1137_v32 = vshrl.u32 (!%p196_p2), %v242_v30, 7 }
   0x8   : > { %s1037_s30 = smov (!%p196_p2), 72   ;;  %s1038_s8 = smov (!%p196_p2), 40  }
   0x9   : > { %s1039_s9 = smov (!%p196_p2), 88   ;;  %s1040_s10 = smov (!%p196_p2), 8   ;;  %vm246_vm2 = vcmp.le.s32.totalorder (!%p196_p2), %v1135_v31, %v1137_v32 }
   0xa   : > { %s1041_s11 = smov (!%p196_p2), 104   ;;  %s1042_s12 = smov (!%p196_p2), 80  }
   0xb   : > { %s1043_s13 = smov (!%p196_p2), 32   ;;  %s1044_s14 = smov (!%p196_p2), 48  }
   0xc   : > { %s1045_s15 = smov (!%p196_p2), 96   ;;  %s1046_s16 = smov (!%p196_p2), 16  }
   0xd   : > { %s1219_s19 = smov (!%p225_p3, %s897_s19), 1 }
   0xe   : > { %s902_s23 = sshll.u32 %s1219_s19, 2 }
   0xf   : > { %s228_s26 = scalar_lea.vmem %s1212_s0, %s902_s23 }
  0x10   : > { %v238_v1 = vld [vmem:[%s228_s26] sm:$0xf] }
  0x11   : > { %v1100_v2 = vunpack.c.l.bf16 %v238_v1 }
  0x13   : > { %v247_v3 = vsub.f32 0.0, %v1100_v2  ;;  %269 = vrot.lane.b32.xlu1 %v1100_v2, %s1034_s27  ;;  %v288_v19 = vmul.f32 %v1090_v0, %v1100_v2  ;;  %s903_s27 = sshll.u32 %s1219_s19, 3 }
  0x15   : > { %249 = vrot.lane.b32.xlu0 %v247_v3, %s1035_s28 }
  0x17   : > { %274 = vrot.lane.b32.xlu1 %v247_v3, %s1036_s29 }
  0x19   : > { %253 = vrot.lane.b32.xlu0 %v1100_v2, %s1037_s30  ;;  %s232_s30 = scalar_lea.vmem %s1216_s4, %s903_s27 }
  0x78   : > { %v260_v4 = vpop.permute.xlu1 %259 }
  0x79   : > { %v262_v13 = vmul.f32 %v260_v4, %v1100_v2 }
  0x85   : > { %v1106_v5 = vpop.permute.xlu1 %269 }
  0x86   : > { %v272_v6 = vsub.f32 0.0, %v1106_v5  ;;  %v995_v12 = vpack.i.bf16 %v1106_v5, %v1100_v2  ;;  %v289_v28 = vmul.f32 %v1106_v5, %v1090_v0 }
  0x87   : > { %v250_v7 = vpop.permute.xlu0 %249 }
  0x88   : > { %276 = vrot.lane.b32.xlu1 %v272_v6, %s1036_s29 }
  0x89   : > { %v275_v18 = vpop.permute.xlu1 %274 }
  0x8b   : > { %v254_v9 = vpop.permute.xlu0 %253 }
  0x8c   : > { %v257_v10 = vsel %vm256_vm0, %v250_v7, %v254_v9  ;;  %489 = vrot.lane.b32.xlu1 %v247_v3, %s1038_s8  ;;  %s236_s8 = scalar_lea.vmem %s1217_s5, %s903_s27 }
  0x8d   : > { %v263_v11 = vmul.f32 %v257_v10, %v1112_v8 }
  0x8f   : > { %265 = vrot.lane.b32.xlu0 %v263_v11, %s1033_s22 }
  0x90   : > { %506 = vrot.lane.b32.xlu1 %v247_v3, %s1039_s9 }
  0x93   : > { %996 = vrot.lane.b32.xlu0 %v995_v12, %s1040_s10 }
  0x94   : > { %508 = vrot.lane.b32.xlu1 %v272_v6, %s1039_s9 }
  0xfa   : > { %v277_v24 = vpop.permute.xlu1 %276 }
  0xfe   : > { %v490_v40 = vpop.permute.xlu1 %489 }
 0x101   : > { %v266_v14 = vpop.permute.xlu0 %265 }
 0x102   : > { %v268_v15 = vadd.f32 %v266_v14, %v262_v13  ;;  %v507_v45 = vpop.permute.xlu1 %506 }
 0x104   : > { %295 = vrot.lane.b32.xlu0 %v268_v15, %s1033_s22 }
 0x105   : > { %v997_v16 = vpop.permute.xlu0 %996 }
 0x106   : > { %v998_v17 = vunpack.i.l.bf16 %v997_v16  ;;  %v999_v23 = vunpack.i.h.bf16 %v997_v16  ;;  %v509_v49 = vpop.permute.xlu1 %508 }
 0x108   : > { %492 = vrot.lane.b32.xlu0 %v1100_v2, %s1035_s28  ;;  %v286_v20 = vsel %vm256_vm0, %v275_v18, %v998_v17  ;;  %v287_v25 = vsel %vm256_vm0, %v277_v24, %v999_v23 }
 0x109   : > { %v290_v21 = vmul.f32 %v286_v20, %v1112_v8  ;;  %v291_v26 = vmul.f32 %v287_v25, %v1112_v8 }
 0x10b   : > { %v292_v22 = vadd.f32 %v290_v21, %v288_v19  ;;  %v293_v29 = vadd.f32 %v291_v26, %v289_v28 }
 0x10c   : > { %1001 = vrot.lane.b32.xlu0 %v995_v12, %s1041_s11 }
 0x10d   : > { %941 = vmatprep.mubr.msk.f32.mxu0 %vm297_vm1, %v292_v22 }
 0x176   : > { %v296_v27 = vpop.permute.xlu0 %295 }
 0x177   : > { %939 = vmatprep.subr.msk.mxu0 %vm297_vm1, %v296_v27 }
 0x178   : > { %940 = vmatpush3.xpose.msk.msra.mxu0 %vm297_vm1, %v296_v27 }
 0x17a   : > { %v493_v39 = vpop.permute.xlu0 %492 }
 0x17b   : > { %942 = vmatmul.mubr.msk.f32.vlgmr.msra.gmra.mrb[0].mxu0 %vm297_vm1, %v293_v29  ;;  %v495_v42 = vsel %vm256_vm0, %v490_v40, %v493_v39 }
 0x17c   : > { %v500_v44 = vmul.f32 %v495_v42, %v1112_v8 }
 0x17e   : > { %v1002_v41 = vpop.permute.xlu0 %1001 }
 0x17f   : > { %v1003_v43 = vunpack.i.l.bf16 %v1002_v41  ;;  %v1004_v48 = vunpack.i.h.bf16 %v1002_v41 }
 0x181   : > { %v518_v46 = vsel %vm256_vm0, %v507_v45, %v1003_v43  ;;  %v519_v50 = vsel %vm256_vm0, %v509_v49, %v1004_v48  ;;  %v1005_v45 = vld [vmem:[%s1215_s3] sm:$0xff]   ;;  %v1008_v48 = vld [vmem:[%s1215_s3 + $0x18] sm:$0xff]  }
 0x182   : > { %v525_v47 = vmul.f32 %v518_v46, %v1112_v8  ;;  %v526_v51 = vmul.f32 %v519_v50, %v1112_v8  ;;  %v1006_v46 = vld [vmem:[%s1215_s3 + $0x8] sm:$0xff]  }
 0x24e   : > { %v943_v33 = vpop.f32.mrb[0].mxu0 }
 0x24f   : > { %v382_v34 = vsel %vm246_vm2, %v943_v33, -1e+30  ;;  %v372_v35 = vpop.f32.mrb[1].mxu0 }
 0x250   : > { %v381_v36 = vsel %vm246_vm2, %v372_v35, -1e+30  ;;  %v386_v37 = vsel %vm256_vm0, %v382_v34, -inf }
 0x251   : > { %387 = vmax.xlane.f32.xlu1 %v386_v37  ;;  %v383_v38 = vsel %vm256_vm0, %v381_v36, -inf }
 0x252   : > { %384 = vmax.xlane.f32.xlu0 %v383_v38 }
 0x262   : > { %502 = vrot.lane.b32.xlu1 %v500_v44, %s1042_s12 }
 0x266   : > { %529 = vrot.lane.b32.xlu1 %v525_v47, %s1043_s13  ;;  %v1007_v47 = vld [vmem:[%s1215_s3 + $0x10] sm:$0xff]  }
 0x268   : > { %496 = vrot.lane.b32.xlu0 %v1090_v0, %s1042_s12 }
 0x26c   : > { %520 = vrot.lane.b32.xlu0 %v1090_v0, %s1043_s13 }
 0x270   : > { %531 = vrot.lane.b32.xlu0 %v526_v51, %s1043_s13 }
 0x274   : > { %405 = vrot.lane.b32.xlu0 %v1100_v2, %s1043_s13 }
 0x2de   : > { %v388_v52 = vpop.xlane.xlu1 %387 }
 0x2df   : > { %v390_v53 = vsub.f32 %v382_v34, %v388_v52  ;;  %v385_v54 = vpop.xlane.xlu0 %384 }
 0x2e0   : > { %v389_v1 = vsub.f32 %v381_v36, %v385_v54 }
 0x2e1   : > { %v393_v55 = vmul.f32 1.442695, %v390_v53 }
 0x2e2   : > { %v503_v58 = vpop.permute.xlu1 %502  ;;  %v391_v3 = vmul.f32 1.442695, %v389_v1 }
 0x2e3   : > { %1009 = vpow2.f32 %v393_v55  ;;  %v497_v56 = vpop.permute.xlu0 %496 }
 0x2e4   : > { %v499_v57 = vmul.f32 %v497_v56, %v1100_v2  ;;  %1011 = vpow2.f32 %v391_v3 }
 0x2e6   : > { %v505_v59 = vadd.f32 %v503_v58, %v499_v57  ;;  %v530_v10 = vpop.permute.xlu1 %529  ;;  %v829_v58 = vld [vmem:[%s232_s30] sm:$0xff] }
 0x2e7   : > { %v521_v60 = vpop.permute.xlu0 %520 }
 0x2e8   : > { %544 = vrot.lane.b32.xlu1 %v505_v59, %s1044_s14  ;;  %v524_v4 = vmul.f32 %v521_v60, %v1106_v5  ;;  %v523_v9 = vmul.f32 %v521_v60, %v1100_v2 }
 0x2ea   : > { %v535_v11 = vadd.f32 %v530_v10, %v523_v9 }
 0x2eb   : > { %v532_v61 = vpop.permute.xlu0 %531 }
 0x2ec   : > { %v536_v6 = vadd.f32 %v532_v61, %v524_v4 }
 0x2ed   : > { %v1010_v62 = vpop.eup %1009 }
 0x2ee   : > { %v398_v63 = vsel %vm256_vm0, %v1010_v62, 0.0  ;;  %v1012_v7 = vpop.eup %1011 }
 0x2ef   : > { %399 = vadd.xlane.f32.xlu0 %v398_v63  ;;  %v406_v0 = vpop.permute.xlu0 %405  ;;  %v395_v8 = vsel %vm256_vm0, %v1012_v7, 0.0 }
 0x2f0   : > { %944 = vmatprep.subr.mxu0 %v406_v0 }
 0x2f1   : > { %945 = vmatpush3.msra.mxu0 %v406_v0 }
 0x305   : > { %541 = vrot.lane.b32.xlu0 %v536_v6, %s1045_s15 }
 0x30c   : > { %396 = vadd.xlane.f32.xlu1 %v395_v8 }
 0x31d   : > { %539 = vrot.lane.b32.xlu1 %v535_v11, %s1045_s15 }
 0x35a   : > { %v545_v12 = vpop.permute.xlu1 %544 }
 0x35b   : > { %949 = vmatprep.subr.msk.mxu0 %vm297_vm1, %v545_v12 }
 0x37c   : > { %v400_v13 = vpop.xlane.xlu0 %399 }
 0x37d   : > { %1013 = vrcp.f32 %v400_v13 }
 0x380   : > { %v542_v19 = vpop.permute.xlu0 %541 }
 0x387   : > { %v1014_v5 = vpop.eup %1013 }
 0x388   : > { %v404_v17 = vmul.f32 %v1014_v5, %v1010_v62 }
 0x399   : > { %v397_v14 = vpop.xlane.xlu1 %396 }
 0x39a   : > { %1015 = vrcp.f32 %v397_v14 }
 0x39d   : > { %v540_v18 = vpop.permute.xlu1 %539 }
 0x3a4   : > { %v1016_v15 = vpop.eup %1015 }
 0x3a5   : > { %v402_v16 = vmul.f32 %v1016_v15, %v1012_v7 }
 0x3a7   : > { %946 = vmatprep.mubr.msk.f32.mxu0 %vm256_vm0, %v402_v16 }
 0x3a8   : > { %947 = vmatmul.mubr.msk.f32.vlgmr.msra.gmra.mrb[2].mxu0 %vm256_vm0, %v404_v17 }
 0x3a9   : > { %950 = vmatpush3.xpose.msk.msra.mxu0 %vm297_vm1, %v545_v12  ;;  %951 = vmatprep.mubr.msk.f32.mxu0 %vm297_vm1, %v540_v18 }
 0x3ac   : > { %952 = vmatmul.mubr.msk.f32.vlgmr.msra.gmra.mrb[4].mxu0 %vm297_vm1, %v542_v19 }
 0x47b   : > { %v948_v20 = vpop.f32.mrb[2].mxu0 }
 0x47c   : > { %v480_v21 = vpop.f32.mrb[3].mxu0 }
 0x47f   : > { %v953_v22 = vpop.f32.mrb[4].mxu0 }
 0x480   : > { %v628_v23 = vsel %vm246_vm2, %v953_v22, -1e+30  ;;  %v618_v24 = vpop.f32.mrb[5].mxu0 }
 0x481   : > { %v627_v25 = vsel %vm246_vm2, %v618_v24, -1e+30  ;;  %v632_v26 = vsel %vm256_vm0, %v628_v23, -inf }
 0x482   : > { %633 = vmax.xlane.f32.xlu0 %v632_v26  ;;  %v629_v27 = vsel %vm256_vm0, %v627_v25, -inf }
 0x483   : > { %630 = vmax.xlane.f32.xlu1 %v629_v27 }
 0x50f   : > { %v634_v28 = vpop.xlane.xlu0 %633 }
 0x510   : > { %v636_v29 = vsub.f32 %v628_v23, %v634_v28  ;;  %v631_v30 = vpop.xlane.xlu1 %630 }
 0x511   : > { %v635_v33 = vsub.f32 %v627_v25, %v631_v30 }
 0x512   : > { %v639_v34 = vmul.f32 1.442695, %v636_v29 }
 0x513   : > { %v637_v35 = vmul.f32 1.442695, %v635_v33 }
 0x514   : > { %1017 = vpow2.f32 %v639_v34 }
 0x515   : > { %1019 = vpow2.f32 %v637_v35 }
 0x51e   : > { %v1018_v36 = vpop.eup %1017 }
 0x51f   : > { %v1020_v37 = vpop.eup %1019  ;;  %v644_v38 = vsel %vm256_vm0, %v1018_v36, 0.0 }
 0x520   : > { %645 = vadd.xlane.f32.xlu1 %v644_v38  ;;  %v641_v31 = vsel %vm256_vm0, %v1020_v37, 0.0 }
 0x521   : > { %642 = vadd.xlane.f32.xlu0 %v641_v31 }
 0x531   : > { %736 = vrot.lane.b32.xlu1 %v948_v20, %s1046_s16 }
 0x537   : > { %651 = vrot.lane.b32.xlu0 %v1100_v2, %s1046_s16  ;;  %v1047_v2 = vmov 0.0  }
 0x538   : > { %959 = vmatprep.subr.bf16.mxu1 %v1047_v2  ;;  %967 = vmatprep.mubr.msk.bf16.mxu1 %vm1048_vm3, %v1047_v2 }
 0x539   : > { %960 = vmatpush3.bf16.msra.mxu1 %v1005_v45 }
 0x53a   : > { %961 = vmatprep.subr.bf16.mxu1 %v1047_v2 }
 0x53d   : > { %962 = vmatpush3.bf16.msra.mxu1 %v1006_v46 }
 0x53e   : > { %963 = vmatprep.subr.bf16.mxu1 %v1047_v2 }
 0x541   : > { %964 = vmatpush3.bf16.msra.mxu1 %v1007_v47 }
 0x542   : > { %965 = vmatprep.subr.bf16.mxu1 %v1047_v2 }
 0x545   : > { %966 = vmatpush3.bf16.msra.mxu1 %v1008_v48 }
 0x5ad   : > { %v646_v32 = vpop.xlane.xlu1 %645 }
 0x5ae   : > { %1021 = vrcp.f32 %v646_v32  ;;  %v643_v39 = vpop.xlane.xlu0 %642 }
 0x5af   : > { %1023 = vrcp.f32 %v643_v39 }
 0x5b1   : > { %v737_v51 = vpop.permute.xlu1 %736 }
 0x5b2   : > { %v652_v40 = vpop.permute.xlu0 %651  ;;  %v747_v52 = vsel %vm297_vm1, %v480_v21, %v737_v51 }
 0x5b3   : > { %954 = vmatprep.subr.mxu0 %v652_v40 }
 0x5b4   : > { %955 = vmatpush3.msra.mxu0 %v652_v40 }
 0x5b8   : > { %v1022_v41 = vpop.eup %1021 }
 0x5b9   : > { %v1024_v42 = vpop.eup %1023  ;;  %v650_v44 = vmul.f32 %v1022_v41, %v1018_v36 }
 0x5ba   : > { %v648_v43 = vmul.f32 %v1024_v42, %v1020_v37 }
 0x5bc   : > { %956 = vmatprep.mubr.msk.f32.mxu0 %vm256_vm0, %v648_v43 }
 0x5bd   : > { %957 = vmatmul.mubr.msk.f32.vlgmr.msra.gmra.mrb[6].mxu0 %vm256_vm0, %v650_v44 }
 0x690   : > { %v958_v49 = vpop.f32.mrb[6].mxu0 }
 0x691   : > { %744 = vrot.lane.b32.xlu0 %v958_v49, %s1044_s14  ;;  %v726_v50 = vpop.f32.mrb[7].mxu0 }
 0x692   : > { %740 = vrot.lane.b32.xlu1 %v726_v50, %s1043_s13 }
 0x703   : > { %v745_v54 = vpop.permute.xlu0 %744 }
 0x704   : > { %v741_v53 = vpop.permute.xlu1 %740 }
 0x705   : > { %v749_v55 = vsel %vm748_vm4, %v747_v52, %v741_v53 }
 0x706   : > { %v751_v56 = vsel %vm750_vm5, %v749_v55, %v745_v54 }
 0x707   : > { %v752_v57 = vpack.c.bf16 %v751_v56, %v751_v56 }
 0x709   : > { %968 = vmatmul.mubr.msk.bf16.vlgmr.msra.gmra.mrb[0].mxu1 %vm785_vm6, %v752_v57 }
 0x7dc   : > { %v823_v59 = vpop.f32.mrb[0].mxu1 }
 0x7dd   : > { %v830_v60 = vadd.f32 %v829_v58, %v823_v59  ;;  %v969_v61 = vpop.f32.mrb[1].mxu1 }
 0x7de   : > { %v826_v62 = vpop.f32.mrb[2].mxu1 }
 0x7df   : > { %831 = vst.msk [vmem:[%s236_s8] sm:$0xff] %vm785_vm6, %v830_v60  ;;  %v970_v63 = vpop.f32.mrb[3].mxu1 }
 0x7e0 PF: > { %s15_s18 = sadd.s32 1, %s1031_s18  }
 0x7e1   : > { %p12_p4 = scmp.ge.s32.totalorder %s15_s18, 4  }
 0x7e3   :  { %14 = sbr.rel (!%p12_p4) target bundleno = 1 (0x1), region = 73 }

// kernel: forward.13
= control target key start
LH: loop header
LB: loop body
LE: loop exit
PB: predicated region body
PF: predicated region fallthrough
CT: control target
= control target key end

     0   :  { %s820_s15 = smov 0   ;;  %s822_s16 = smov 0   ;;  %s930_s0 = inlined_call_operand.vmem [shape: f32[16,64], index: 0, kind: input, shape index: {}]   ;;  %s931_s1 = inlined_call_operand.vmem [shape: f32[1,64], index: 1, kind: input, shape index: {}]   ;;  %s932_s2 = inlined_call_operand.vmem [shape: bf16[64,256], index: 2, kind: input, shape index: {}]   ;;  %s933_s3 = inlined_call_operand.vmem [shape: s32[16,1], index: 3, kind: input, shape index: {}]   ;;  %s934_s4 = inlined_call_operand.vmem [shape: f32[16,1], index: 4, kind: output, shape index: {}]  }
   0x1   :  { %s824_s17 = smov 0   ;;  %s826_s18 = smov 0  }
   0x2   :  { %s828_s19 = smov 0  }
   0x3 LB: > { %s23_s20 = sadd.s32 1, %s783_s18  ;;  %p87_p1 = scmp.ne.s32.totalorder %s775_s16, %s771_s15  ;;  %s787_s19 = sphi %s828_s19, %s14_s19   ;;  %s783_s18 = sphi %s826_s18, %s938_s18   ;;  %s779_s17 = sphi %s824_s17, %s937_s17   ;;  %s775_s16 = sphi %s822_s16, %s936_s16   ;;  %s771_s15 = sphi %s820_s15, %s935_s15  }
   0x4   : > { %p24_p0 = scmp.ge.s32.totalorder %s23_s20, 2  ;;  %p88_p2 = scmp.eq.s32.totalorder %s787_s19, 0 }
   0x5   : > { %s80_s22 = sadd.s32 1, %s775_s16  ;;  %p644_p5 = scmp.ge.s32.totalorder %s787_s19, 2 }
   0x6   : > { %s940_s20 = smov (%p24_p0, %s23_s20), 0  ;;  %p89_p3 = por %p88_p2, %p87_p1 }
   0x7   : > { %s77_s21 = ssub.s32 %s783_s18, %s940_s20  ;;  %186 = sbr.rel (%p644_p5) target bundleno = 23 (0x17), region = 28 }
   0x8   : > { %p78_p4 = scmp.eq.s32.totalorder %s77_s21, 0 }
   0xa   : > { %s855_s23 = scalar_select %p78_p4, %s775_s16, %s80_s22  }
   0xe   : > { %189 = sbr.rel (!%p89_p3) target bundleno = 23 (0x17), region = 32  ;;  %s191_s24 = sand.u32 (%p89_p3), 1, %s775_s16  }
   0xf   : > { %s646_s25 = sshll.u32 (%p89_p3), %s783_s18, 2  ;;  %s645_s26 = sshll.u32 (%p89_p3), %s191_s24, 5 }
  0x10   : > { %s195_s29 = scalar_lea.vmem (%p89_p3), %s932_s2, %s646_s25  ;;  %s193_s30 = scalar_lea.vmem (%p89_p3), [#allocation5], %s645_s26 }
  0x11   : > { %v211_v0 = vld [vmem:[%s195_s29] sm:$0xf] (%p89_p3)  ;;  %v213_v1 = vld [vmem:[%s195_s29 + $0x8] sm:$0xf] (%p89_p3)  ;;  %v215_v2 = vld [vmem:[%s195_s29 + $0x10] sm:$0xf] (%p89_p3) }
  0x12   : > { %212 = vst [vmem:[%s193_s30] sm:$0xf] (%p89_p3), %v211_v0  ;;  %214 = vst [vmem:[%s193_s30 + $0x4] sm:$0xf] (%p89_p3), %v213_v1  ;;  %v217_v3 = vld [vmem:[%s195_s29 + $0x18] sm:$0xf] (%p89_p3) }
  0x13   : > { %v219_v4 = vld [vmem:[%s195_s29 + $0x20] sm:$0xf] (%p89_p3)  ;;  %216 = vst [vmem:[%s193_s30 + $0x8] sm:$0xf] (%p89_p3), %v215_v2  ;;  %218 = vst [vmem:[%s193_s30 + $0xc] sm:$0xf] (%p89_p3), %v217_v3 }
  0x14   : > { %220 = vst [vmem:[%s193_s30 + $0x10] sm:$0xf] (%p89_p3), %v219_v4  ;;  %v221_v5 = vld [vmem:[%s195_s29 + $0x28] sm:$0xf] (%p89_p3)  ;;  %v223_v6 = vld [vmem:[%s195_s29 + $0x30] sm:$0xf] (%p89_p3) }
  0x15   : > { %v225_v7 = vld [vmem:[%s195_s29 + $0x38] sm:$0xf]  ;;  %222 = vst [vmem:[%s193_s30 + $0x14] sm:$0xf] %v221_v5  ;;  %224 = vst [vmem:[%s193_s30 + $0x18] sm:$0xf] %v223_v6 }
  0x16   : > { %226 = vst [vmem:[%s193_s30 + $0x1c] sm:$0xf] %v225_v7 }
  0x17 PF: > { %p647_p6 = scmp.ge.s32.totalorder %s787_s19, 1  ;;  %p264_p7 = scmp.lt.s32.totalorder %s787_s19, 3 }
  0x19   : > { %p265_p8 = pnand %p647_p6, %p264_p7 }
  0x1a   : > { %s271_s5 = sand.u32 (!%p265_p8), 1, %s771_s15   ;;  %p649_p9 = scmp.ne.s32.totalorder (!%p265_p8), %s779_s17, 0 }
  0x1b   : > { %268 = sbr.rel (%p265_p8) target bundleno = 887 (0x377), region = 73  ;;  %s648_s6 = sshll.u32 (!%p265_p8), %s271_s5, 5 }
  0x1c   : > { %s866_s7 = scalar_lea.vmem (!%p265_p8), [#allocation5], %s648_s6 }
  0x22   : > { %328 = sbr.rel (%p649_p9) target bundleno = 41 (0x29), region = 81  ;;  %vm329_vm0 = vcmask (!%p649_p9), 7168   ;;  %v789_v8 = vmov (!%p649_p9), -inf   ;;  %v790_v9 = vmov (!%p649_p9), 0.0  }
  0x23   : > { %330 = vst.msk [vmem:[#allocation2] sm:$0xff] (!%p649_p9), %vm329_vm0, %v789_v8  ;;  %331 = vst.msk [vmem:[#allocation2 + $0x8] sm:$0xff] (!%p649_p9), %vm329_vm0, %v789_v8 }
  0x24   : > { %332 = vst.msk [vmem:[#allocation3] sm:$0xff] (!%p649_p9), %vm329_vm0, %v790_v9  ;;  %333 = vst.msk [vmem:[#allocation3 + $0x8] sm:$0xff] (!%p649_p9), %vm329_vm0, %v790_v9 }
  0x25   : > { %334 = vst.msk [vmem:[#allocation4] sm:$0xff] (!%p649_p9), %vm329_vm0, %v790_v9  ;;  %335 = vst.msk [vmem:[#allocation4 + $0x8] sm:$0xff] (!%p649_p9), %vm329_vm0, %v790_v9 }
  0x29 PF: > { %v336_v10 = vld [vmem:[%s930_s0] sm:$0xff]  ;;  %vm340_vm1 = vcmask 523264   ;;  %v337_v11 = vld [vmem:[%s930_s0 + $0x8] sm:$0xff]  ;;  %v729_v16 = vld [vmem:[%s866_s7] sm:$0xff]   ;;  %v791_v17 = vmov 0.0   ;;  %vm792_vm2 = vmmov 0   ;;  %v444_v50 = vlaneseq }
  0x2a   : > { %v338_v12 = vmul.f32 %v336_v10, %v336_v10  ;;  %v339_v13 = vmul.f32 %v337_v11, %v337_v11  ;;  %669 = vmatprep.subr.bf16.mxu0 %v791_v17  ;;  %677 = vmatprep.mubr.msk.bf16.mxu0 %vm792_vm2, %v791_v17  ;;  %v730_v18 = vld [vmem:[%s866_s7 + $0x8] sm:$0xff]   ;;  %v731_v19 = vld [vmem:[%s866_s7 + $0x10] sm:$0xff]   ;;  %v732_v20 = vld [vmem:[%s866_s7 + $0x18] sm:$0xff]   ;;  %v793_v39 = vmov 0   ;;  %vm467_vm3 = vcmask 7168   ;;  %s656_s24 = sshll.u32 %s779_s17, 7 }
  0x2b   : > { %670 = vmatpush3.bf16.msra.mxu0 %v729_v16  ;;  %v650_v30 = vld [vmem:[%s931_s1] ss:$0 sm:$0xff]  ;;  %727 = vset.pattern.permute.xlu0 %v793_v39  ;;  %v471_v43 = vld [vmem:[#allocation2 + $0x8] sm:$0xff]  ;;  %v445_v53 = vand.u32 127, %v444_v50  ;;  %v447_v54 = vstv %s656_s24  ;;  %v478_v8 = vld [vmem:[#allocation3] sm:$0xff]  ;;  %p657_p10 = scmp.ne.s32.totalorder %s779_s17, 1 }
  0x2c   : > { %v341_v14 = vsel %vm340_vm1, %v338_v12, 0.0  ;;  %v344_v15 = vsel %vm340_vm1, %v339_v13, 0.0  ;;  %671 = vmatprep.subr.bf16.mxu0 %v791_v17  ;;  %728 = vset.pattern.permute.xlu1 %v793_v39  ;;  %v470_v40 = vld [vmem:[#allocation2] sm:$0xff]  ;;  %v896_v49 = vld [vmem:[%s933_s3 + $0x8] sm:$0xff] }
  0x2d   : > { %342 = vadd.xlane.f32.xlu0 %v341_v14  ;;  %v890_v48 = vld [vmem:[%s933_s3] sm:$0xff]  ;;  %v448_v58 = vadd.s32 %v447_v54, %v445_v53  ;;  %v450_v9 = vld [vmem:[#allocation4 + $0x8] sm:$0xff]  ;;  %vm519_vm7 = vcmp.ne.s32.totalorder (!%p657_p10), %v896_v49, 4294967196 }
  0x2e   : > { %v449_v4 = vld [vmem:[#allocation4] sm:$0xff]  ;;  %vm518_vm6 = vcmp.ne.s32.totalorder (!%p657_p10), %v890_v48, 4294967196 }
  0x2f   : > { %672 = vmatpush3.bf16.msra.mxu0 %v730_v18 }
  0x30   : > { %673 = vmatprep.subr.bf16.mxu0 %v791_v17 }
  0x31   : > { %345 = vadd.xlane.f32.xlu0 %v344_v15  ;;  %v479_v15 = vld [vmem:[#allocation3 + $0x8] sm:$0xff] }
  0x33   : > { %674 = vmatpush3.bf16.msra.mxu0 %v731_v19 }
  0x34   : > { %675 = vmatprep.subr.bf16.mxu0 %v791_v17 }
  0x37   : > { %676 = vmatpush3.bf16.msra.mxu0 %v732_v20 }
  0xba   : > { %v343_v21 = vpop.xlane.xlu0 %342 }
  0xbb   : > { %v348_v22 = vmul.f32 0.015625, %v343_v21 }
  0xbd   : > { %v350_v23 = vadd.f32 1e-06, %v348_v22 }
  0xbe   : > { %v346_v24 = vpop.xlane.xlu0 %345 }
  0xbf   : > { %733 = vrsqrt.f32 %v350_v23  ;;  %v349_v25 = vmul.f32 0.015625, %v346_v24 }
  0xc1   : > { %v351_v26 = vadd.f32 1e-06, %v349_v25 }
  0xc3   : > { %735 = vrsqrt.f32 %v351_v26 }
  0xc9   : > { %v734_v27 = vpop.eup %733 }
  0xca   : > { %v354_v28 = vmul.f32 %v734_v27, %v336_v10 }
  0xcc   : > { %v363_v32 = vmul.f32 %v650_v30, %v354_v28 }
  0xcd   : > { %v736_v29 = vpop.eup %735 }
  0xce   : > { %v355_v31 = vmul.f32 %v736_v29, %v337_v11 }
  0xd0   : > { %v364_v33 = vmul.f32 %v650_v30, %v355_v31  ;;  %v794_v31 = vmov (!%p657_p10), 0.0  }
  0xd2   : > { %v365_v34 = vpack.c.bf16 %v364_v33, %v363_v32  ;;  %v658_v32 = vsel (!%p657_p10), %vm518_vm6, 1.0, %v794_v31 }
  0xd4   : > { %678 = vmatmul.mubr.msk.bf16.vlgmr.msra.gmra.mrb[0].mxu0 %vm340_vm1, %v365_v34 }
 0x1a7   : > { %v435_v35 = vpop.f32.mrb[0].mxu0 }
 0x1a8   : > { %472 = vmax.xlane.f32.xlu1 %v435_v35  ;;  %v679_v36 = vpop.f32.mrb[1].mxu0 }
 0x1a9   : > { %v438_v37 = vpop.f32.mrb[2].mxu0 }
 0x1aa   : > { %v680_v38 = vpop.f32.mrb[3].mxu0 }
 0x1ac   : > { %474 = vmax.xlane.f32.xlu1 %v438_v37 }
 0x235   : > { %v473_v41 = vpop.xlane.xlu1 %472 }
 0x236   : > { %v476_v42 = vmax.f32 %v470_v40, %v473_v41 }
 0x238   : > { %v480_v44 = vsub.f32 %v470_v40, %v476_v42  ;;  %512 = vst.msk [vmem:[#allocation2] sm:$0xff] %vm467_vm3, %v476_v42  ;;  %490 = vperm.xlu0 %727, %v476_v42  }
 0x239   : > { %v475_v45 = vpop.xlane.xlu1 %474 }
 0x23a   : > { %v477_v46 = vmax.f32 %v471_v43, %v475_v45  ;;  %v482_v2 = vmul.f32 1.442695, %v480_v44 }
 0x23c   : > { %v481_v47 = vsub.f32 %v471_v43, %v477_v46  ;;  %513 = vst.msk [vmem:[#allocation2 + $0x8] sm:$0xff] %vm467_vm3, %v477_v46  ;;  %495 = vperm.xlu1 %728, %v477_v46  }
 0x23e   : > { %v484_v3 = vmul.f32 1.442695, %v481_v47 }
 0x23f   : > { %v524_v23 = vld [vmem:[#allocation2] sm:$0xff] (!%p657_p10) }
 0x240   : > { %452 = vperm.xlu1 %728, %v890_v48  }
 0x243   : > { %v525_v26 = vld [vmem:[#allocation2 + $0x8] sm:$0xff] (!%p657_p10) }
 0x244   : > { %455 = vperm.xlu1 %728, %v896_v49  }
 0x2b7   : > { %v491_v51 = vpop.permute.xlu0 %490 }
 0x2b8   : > { %v498_v52 = vsub.f32 %v435_v35, %v491_v51 }
 0x2ba   : > { %v500_v55 = vmul.f32 1.442695, %v498_v52 }
 0x2bb   : > { %v496_v56 = vpop.permute.xlu1 %495 }
 0x2bc   : > { %737 = vpow2.f32 %v500_v55  ;;  %v499_v57 = vsub.f32 %v438_v37, %v496_v56 }
 0x2be   : > { %v502_v59 = vmul.f32 1.442695, %v499_v57 }
 0x2bf   : > { %v453_v60 = vpop.permute.xlu1 %452 }
 0x2c0   : > { %739 = vpow2.f32 %v502_v59  ;;  %vm457_vm4 = vcmp.eq.s32.totalorder %v448_v58, %v453_v60 }
 0x2c1   : > { %v459_v61 = vsel %vm457_vm4, %v435_v35, 0.0  ;;  %741 = vpow2.f32 %v482_v2  ;;  %v659_v35 = vsel (!%p657_p10), %vm519_vm7, 1.0, %v794_v31 }
 0x2c2   : > { %461 = vadd.xlane.f32.xlu1 %v459_v61  ;;  %743 = vpow2.f32 %v484_v3 }
 0x2c3   : > { %v456_v62 = vpop.permute.xlu1 %455 }
 0x2c4   : > { %vm458_vm5 = vcmp.eq.s32.totalorder %v448_v58, %v456_v62 }
 0x2c5   : > { %v460_v63 = vsel %vm458_vm5, %v438_v37, 0.0 }
 0x2c6   : > { %v738_v0 = vpop.eup %737  ;;  %463 = vadd.xlane.f32.xlu0 %v460_v63 }
 0x2c7   : > { %504 = vadd.xlane.f32.xlu1 %v738_v0 }
 0x2ca   : > { %v740_v1 = vpop.eup %739 }
 0x2cb   : > { %506 = vadd.xlane.f32.xlu1 %v740_v1  ;;  %v742_v6 = vpop.eup %741 }
 0x2cc   : > { %v486_v11 = vmul.f32 %v742_v6, %v478_v8  ;;  %v744_v12 = vpop.eup %743 }
 0x2cd   : > { %v487_v17 = vmul.f32 %v744_v12, %v479_v15 }
 0x34f   : > { %v462_v5 = vpop.xlane.xlu1 %461 }
 0x350   : > { %v465_v7 = vadd.f32 %v462_v5, %v449_v4 }
 0x352   : > { %468 = vst.msk [vmem:[#allocation4] sm:$0xff] %vm467_vm3, %v465_v7 }
 0x353   : > { %v464_v10 = vpop.xlane.xlu0 %463 }
 0x354   : > { %v466_v13 = vadd.f32 %v464_v10, %v450_v9  ;;  %v505_v14 = vpop.xlane.xlu1 %504 }
 0x355   : > { %v508_v16 = vadd.f32 %v505_v14, %v486_v11  ;;  %517 = sbr.rel (%p657_p10) target bundleno = 887 (0x377), region = 85 }
 0x356   : > { %469 = vst.msk [vmem:[#allocation4 + $0x8] sm:$0xff] %vm467_vm3, %v466_v13 }
 0x357   : > { %510 = vst.msk [vmem:[#allocation3] sm:$0xff] %vm467_vm3, %v508_v16 }
 0x358   : > { %v507_v18 = vpop.xlane.xlu1 %506 }
 0x359   : > { %v509_v19 = vadd.f32 %v507_v18, %v487_v17  ;;  %v534_v27 = vld [vmem:[#allocation4] sm:$0xff] (!%p657_p10) }
 0x35b   : > { %511 = vst.msk [vmem:[#allocation3 + $0x8] sm:$0xff] %vm467_vm3, %v509_v19 }
 0x35d   : > { %v535_v30 = vld [vmem:[#allocation4 + $0x8] sm:$0xff] }
 0x35e   : > { %v526_v20 = vld [vmem:[#allocation3] sm:$0xff] }
 0x35f   : > { %745 = vlog2.f32 %v526_v20 }
 0x362   : > { %v527_v21 = vld [vmem:[#allocation3 + $0x8] sm:$0xff] }
 0x363   : > { %747 = vlog2.f32 %v527_v21 }
 0x369   : > { %v746_v22 = vpop.eup %745 }
 0x36a   : > { %v529_v25 = vmul.f32 0.6931472, %v746_v22 }
 0x36c   : > { %v532_v29 = vadd.f32 %v529_v25, %v524_v23 }
 0x36d   : > { %v748_v24 = vpop.eup %747 }
 0x36e   : > { %v531_v28 = vmul.f32 0.6931472, %v748_v24  ;;  %v536_v34 = vsub.f32 %v532_v29, %v534_v27 }
 0x370   : > { %v533_v33 = vadd.f32 %v531_v28, %v525_v26  ;;  %v538_v37 = vmul.f32 %v658_v32, %v536_v34 }
 0x372   : > { %v537_v36 = vsub.f32 %v533_v33, %v535_v30  ;;  %540 = vst.msk [vmem:[%s934_s4] sm:$0xff] %vm467_vm3, %v538_v37 }
 0x374   : > { %v539_v38 = vmul.f32 %v659_v35, %v537_v36 }
 0x376   : > { %541 = vst.msk [vmem:[%s934_s4 + $0x8] sm:$0xff] %vm467_vm3, %v539_v38 }
 0x377 PF: > { %s14_s19 = sadd.s32 1, %s787_s19   ;;  %s935_s15 = smov %s775_s16 }
 0x378   : > { %p11_p11 = scmp.ge.s32.totalorder %s14_s19, 4   ;;  %s936_s16 = smov %s855_s23 }
 0x379   : > { %s937_s17 = smov %s783_s18  ;;  %s938_s18 = smov %s940_s20 }
 0x37a   :  { %13 = sbr.rel (!%p11_p11) target bundleno = 3 (0x3), region = 126 }

</bundles_post_ra>
